<compile_context>
chip_gen: v7x
topology: tpu7x:2x2x1
jax: 0.10.0
libtpu: 0.0.40
codegen_flags: <defaults>
</compile_context>

<pallas_src>
import numpy as np
import jax
import jax.numpy as jnp
from jax import lax
from jax.experimental import pallas as pl
from jax.experimental.pallas import tpu as pltpu

POS_WEIGHT = 20.0  # torch.ones([N]) * 20  (constant per class)


def _round_up(x, m):
    return ((x + m - 1) // m) * m


def _make_kernel(n_valid, n_pad, num_valid_names, tm, tn, pos_weight):
    needs_mask = (n_pad != n_valid)

    def kernel(scale_ref, nid_ref, vid_ref, txt_ref, img_ref, out_ref, acc_ref):
        i = pl.program_id(0)
        j = pl.program_id(1)

        # ---- logits tile: x = scale * T_tile @ I_tile^T  (MXU bf16 in, f32 acc)
        x = lax.dot_general(
            txt_ref[...], img_ref[...],
            dimension_numbers=(((1,), (1,)), ((), ())),
            preferred_element_type=jnp.float32,
        ) * scale_ref[0]

        # ---- label tile rebuilt in-kernel from integer name ids (no N x N HBM matrix)
        nid = nid_ref[...]                              # (tm, 1)  int32 (rows / names)
        match = nid == vid_ref[0:1, :]                  # (tm, tn) bool
        for k in range(1, num_valid_names):
            match = jnp.logical_or(match, nid == vid_ref[k:k + 1, :])
        y = match.astype(jnp.float32)

        # ---- BCE-with-logits, pos_weight=p, single softplus:
        #      p*y*sp(-x) + (1-y)*sp(x) == sp(x)*(1 + (p-1)*y) - p*y*x
        sp = jnp.maximum(x, 0.0) + jnp.log1p(jnp.exp(-jnp.abs(x)))
        per = sp * (1.0 + (pos_weight - 1.0) * y) - pos_weight * y * x

        if needs_mask:  # static: only emitted when N was padded up to the tile size
            rows = lax.broadcasted_iota(jnp.int32, (tm, tn), 0) + i * tm
            cols = lax.broadcasted_iota(jnp.int32, (tm, tn), 1) + j * tn
            keep = jnp.logical_and(rows < n_valid, cols < n_valid)
            per = jnp.where(keep, per, 0.0)

        # ---- VPU-only accumulation across the j (reduction) axis
        @pl.when(j == 0)
        def _():
            acc_ref[...] = per

        @pl.when(j > 0)
        def _():
            acc_ref[...] = acc_ref[...] + per

        # ---- one cross-lane reduce per row tile -> per-row-tile partial sum
        @pl.when(j == pl.num_programs(1) - 1)
        def _():
            out_ref[...] = jnp.full((1, 1, 1), jnp.sum(acc_ref[...]),
                                    dtype=jnp.float32)

    return kernel


def _encode_names(names, valid_names):
    """Map the string matching of ClipLoss.get_multi_label_ground_truth onto
    int32 ids:  labels[i, j] = any_k( name_ids[i] == valid_ids[k, j] )."""
    # TODO(synk): string handling itself has no Pallas equivalent; only this
    # string->int32 encoding runs on the host, the 0/1 mask is built in-kernel.
    n = len(names)
    for col in valid_names:
        assert len(col) == n, "valid_names must be K lists of length N"
    vocab = {}

    def gid(s):
        if s not in vocab:
            vocab[s] = len(vocab)
        return vocab[s]

    name_ids = np.array([gid(s) for s in names], dtype=np.int32)
    valid_ids = np.array([[gid(s) for s in col] for col in valid_names],
                         dtype=np.int32)                          # [K, N]
    return name_ids, valid_ids


def clip_loss(image_features, text_features, logit_scale, names, valid_names,
              *, tile=128):
    """Forward pass of taxonCLIP ClipLoss.

    `valid_names` is K lists of N strings (the layout ClipLoss.forward expects).
    For production batch sizes raise `tile` (256/512 on v7x, up to 1024 on v6e)
    and set pltpu.CompilerParams(vmem_limit_bytes=...) accordingly.
    """
    n, d = image_features.shape
    assert text_features.shape == (n, d)
    assert len(names) == n

    name_ids, valid_ids = _encode_names(names, valid_names)
    k = valid_ids.shape[0]
    assert k >= 1

    tm = tn = tile
    n_pad = _round_up(n, tile)
    gi, gj = n_pad // tm, n_pad // tn

    # pad + pack inputs (sentinels guarantee padded rows/cols never match)
    nid = np.full((n_pad, 1), -2, dtype=np.int32)
    nid[:n, 0] = name_ids
    vid = np.full((k, n_pad), -1, dtype=np.int32)
    vid[:, :n] = valid_ids

    def pad_feat(f):
        f = jnp.asarray(f, jnp.float32)
        if n_pad != n:
            f = jnp.pad(f, ((0, n_pad - n), (0, 0)))
        return f.astype(jnp.bfloat16)  # bf16 into the MXU, f32 accumulation

    txt = pad_feat(text_features)
    img = pad_feat(image_features)
    scale = jnp.reshape(jnp.asarray(logit_scale, jnp.float32), (1,))

    kernel = _make_kernel(n, n_pad, k, tm, tn, POS_WEIGHT)

    partial = pl.pallas_call(
        kernel,
        out_shape=jax.ShapeDtypeStruct((gi, 1, 1), jnp.float32),
        grid_spec=pltpu.PrefetchScalarGridSpec(
            num_scalar_prefetch=0,
            grid=(gi, gj),
            in_specs=[
                pl.BlockSpec(memory_space=pltpu.MemorySpace.SMEM),   # logit_scale (1,)
                pl.BlockSpec((tm, 1), lambda i, j: (i, 0)),          # name ids (rows)
                pl.BlockSpec((k, tn), lambda i, j: (0, j)),          # valid ids (cols)
                pl.BlockSpec((tm, d), lambda i, j: (i, 0)),          # text tile
                pl.BlockSpec((tn, d), lambda i, j: (j, 0)),          # image tile
            ],
            out_specs=pl.BlockSpec((1, 1, 1), lambda i, j: (i, 0, 0)),
            scratch_shapes=[pltpu.VMEM((tm, tn), jnp.float32)],
        ),
        compiler_params=pltpu.CompilerParams(
            dimension_semantics=("parallel", "arbitrary")),
    )(scale, jnp.asarray(nid), jnp.asarray(vid), txt, img)

    # tiny final reduction + mean over the N*N real elements
    return jnp.sum(partial) / float(n * n)


# ----------------------------- validation helpers -----------------------------

def build_labels(names, valid_names):
    # replica of ClipLoss.forward label construction (host-side, for validation)
    valid_names_t = [list(row) for row in zip(*valid_names)]
    n = len(names)
    labels = np.zeros((n, n), dtype=np.float64)
    sets = [set(v) for v in valid_names_t]
    for i, name in enumerate(names):
        for j, s in enumerate(sets):
            if name in s:
                labels[i, j] = 1.0
    return labels


def _ref_loss(img, txt, scale, labels, pos_weight=POS_WEIGHT):
    # full original two-branch formula (float64) as the gold reference
    def sp(z):
        return np.maximum(z, 0.0) + np.log1p(np.exp(-np.abs(z)))

    def bce(x, y):
        return np.mean(pos_weight * y * sp(-x) + (1.0 - y) * sp(x))

    li = scale * img @ txt.T
    lt = scale * txt @ img.T
    return (bce(li, labels.T) + bce(lt, labels)) / 2.0


if __name__ == "__main__":
    # small, non-multiple-of-128 N to exercise the 2x2 grid + padding mask
    N, D, K = 200, 64, 2
    key = jax.random.PRNGKey(0)
    k1, k2 = jax.random.split(key)
    img = jax.random.normal(k1, (N, D), jnp.float32)
    txt = jax.random.normal(k2, (N, D), jnp.float32)
    img = img / jnp.linalg.norm(img, axis=-1, keepdims=True)
    txt = txt / jnp.linalg.norm(txt, axis=-1, keepdims=True)
    logit_scale = 2.5

    names = [f"species_{i}" for i in range(N)]
    per_sample_valid = [[names[i], names[(i + 3) % N]] for i in range(N)]
    valid_names = [list(col) for col in zip(*per_sample_valid)]  # K lists of length N

    loss = clip_loss(img, txt, logit_scale, names, valid_names)
    loss = jax.block_until_ready(loss)

    # reference on the same bf16-rounded features the kernel consumed
    img64 = np.asarray(img.astype(jnp.bfloat16).astype(jnp.float32), dtype=np.float64)
    txt64 = np.asarray(txt.astype(jnp.bfloat16).astype(jnp.float32), dtype=np.float64)
    labels_np = build_labels(names, valid_names)
    ref = _ref_loss(img64, txt64, logit_scale, labels_np)
    assert np.allclose(float(loss), ref, rtol=1e-3, atol=1e-5), (float(loss), ref)

    print("KERNEL_OK")
</pallas_src>

<mosaic_0001>
module attributes {stable_mosaic.version = 11 : i64} {
  func.func @kernel(%arg0: i32, %arg1: i32, %arg2: memref<1xf32, #tpu.memory_space<smem>>, %arg3: memref<128x1xi32, #tpu.memory_space<vmem>>, %arg4: memref<2x128xi32, #tpu.memory_space<vmem>>, %arg5: memref<128x64xbf16, #tpu.memory_space<vmem>>, %arg6: memref<128x64xbf16, #tpu.memory_space<vmem>>, %arg7: memref<1x1x1xf32, #tpu.memory_space<vmem>>, %arg8: memref<128x128xf32, #tpu.memory_space<vmem>>) attributes {dimension_semantics = [#tpu.dimension_semantics<parallel>, #tpu.dimension_semantics<arbitrary>], iteration_bounds = array<i64: 2, 2>, scalar_prefetch = 0 : i64, scratch_operands = 1 : i64, tpu.core_type = #tpu.core_type<tc>, window_params = [{transform_indices = @transform_0, window_bounds = array<i64: 1>}, {transform_indices = @transform_1, window_bounds = array<i64: 128, 1>}, {transform_indices = @transform_2, window_bounds = array<i64: 2, 128>}, {transform_indices = @transform_3, window_bounds = array<i64: 128, 64>}, {transform_indices = @transform_4, window_bounds = array<i64: 128, 64>}, {transform_indices = @transform_5, window_bounds = array<i64: 1, 1, 1>}]} {
    %c0 = arith.constant 0 : index
    %c0_0 = arith.constant 0 : index
    %0 = vector.load %arg5[%c0, %c0_0] : memref<128x64xbf16, #tpu.memory_space<vmem>>, vector<128x64xbf16>
    %c0_1 = arith.constant 0 : index
    %c0_2 = arith.constant 0 : index
    %1 = vector.load %arg6[%c0_1, %c0_2] : memref<128x64xbf16, #tpu.memory_space<vmem>>, vector<128x64xbf16>
    %cst = arith.constant dense<0.000000e+00> : vector<128x128xf32>
    %2 = tpu.matmul %0, %1, %cst {dimension_numbers = #tpu.dot_dimension_numbers<[1], [1], [0], [0], [0, 0, 1, 0], [], []>} : vector<128x64xbf16>, vector<128x64xbf16>, vector<128x128xf32> -> vector<128x128xf32>
    %c0_3 = arith.constant 0 : index
    %3 = memref.load %arg2[%c0_3] : memref<1xf32, #tpu.memory_space<smem>>
    %4 = vector.broadcast %3 : f32 to vector<128x128xf32>
    %5 = arith.mulf %2, %4 : vector<128x128xf32>
    %c0_4 = arith.constant 0 : index
    %c0_5 = arith.constant 0 : index
    %6 = vector.load %arg3[%c0_4, %c0_5] : memref<128x1xi32, #tpu.memory_space<vmem>>, vector<128x1xi32>
    %c0_6 = arith.constant 0 : index
    %c0_7 = arith.constant 0 : index
    %7 = vector.load %arg4[%c0_6, %c0_7] : memref<2x128xi32, #tpu.memory_space<vmem>>, vector<1x128xi32>
    %8 = vector.broadcast %6 : vector<128x1xi32> to vector<128x128xi32>
    %9 = vector.broadcast %7 : vector<1x128xi32> to vector<128x128xi32>
    %10 = arith.cmpi eq, %8, %9 : vector<128x128xi32>
    %c1 = arith.constant 1 : index
    %c0_8 = arith.constant 0 : index
    %11 = vector.load %arg4[%c1, %c0_8] : memref<2x128xi32, #tpu.memory_space<vmem>>, vector<1x128xi32>
    %12 = vector.broadcast %6 : vector<128x1xi32> to vector<128x128xi32>
    %13 = vector.broadcast %11 : vector<1x128xi32> to vector<128x128xi32>
    %14 = arith.cmpi eq, %12, %13 : vector<128x128xi32>
    %15 = arith.ori %10, %14 : vector<128x128xi1>
    %16 = arith.extui %15 : vector<128x128xi1> to vector<128x128xi32>
    %17 = arith.sitofp %16 : vector<128x128xi32> to vector<128x128xf32>
    %cst_9 = arith.constant 0.000000e+00 : f32
    %18 = vector.broadcast %cst_9 : f32 to vector<128x128xf32>
    %19 = arith.maximumf %5, %18 : vector<128x128xf32>
    %20 = math.absf %5 : vector<128x128xf32>
    %cst_10 = arith.constant 0.000000e+00 : f32
    %21 = vector.broadcast %cst_10 : f32 to vector<128x128xf32>
    %22 = arith.subf %21, %20 : vector<128x128xf32>
    %23 = math.exp %22 : vector<128x128xf32>
    %24 = math.log1p %23 : vector<128x128xf32>
    %25 = arith.addf %19, %24 : vector<128x128xf32>
    %cst_11 = arith.constant 1.900000e+01 : f32
    %26 = vector.broadcast %cst_11 : f32 to vector<128x128xf32>
    %27 = arith.mulf %26, %17 : vector<128x128xf32>
    %cst_12 = arith.constant 1.000000e+00 : f32
    %28 = vector.broadcast %cst_12 : f32 to vector<128x128xf32>
    %29 = arith.addf %28, %27 : vector<128x128xf32>
    %30 = arith.mulf %25, %29 : vector<128x128xf32>
    %cst_13 = arith.constant 2.000000e+01 : f32
    %31 = vector.broadcast %cst_13 : f32 to vector<128x128xf32>
    %32 = arith.mulf %31, %17 : vector<128x128xf32>
    %33 = arith.mulf %32, %5 : vector<128x128xf32>
    %34 = arith.subf %30, %33 : vector<128x128xf32>
    %35 = tpu.iota {dimensions = array<i32: 0>} : vector<128x128xi32>
    %c128_i32 = arith.constant 128 : i32
    %36 = arith.muli %arg0, %c128_i32 : i32
    %37 = vector.broadcast %36 : i32 to vector<128x128xi32>
    %38 = arith.addi %35, %37 : vector<128x128xi32>
    %39 = tpu.iota {dimensions = array<i32: 1>} : vector<128x128xi32>
    %c128_i32_14 = arith.constant 128 : i32
    %40 = arith.muli %arg1, %c128_i32_14 : i32
    %41 = vector.broadcast %40 : i32 to vector<128x128xi32>
    %42 = arith.addi %39, %41 : vector<128x128xi32>
    %c200_i32 = arith.constant 200 : i32
    %43 = vector.broadcast %c200_i32 : i32 to vector<128x128xi32>
    %44 = arith.cmpi slt, %38, %43 : vector<128x128xi32>
    %c200_i32_15 = arith.constant 200 : i32
    %45 = vector.broadcast %c200_i32_15 : i32 to vector<128x128xi32>
    %46 = arith.cmpi slt, %42, %45 : vector<128x128xi32>
    %47 = arith.andi %44, %46 : vector<128x128xi1>
    %cst_16 = arith.constant 0.000000e+00 : f32
    %48 = vector.broadcast %cst_16 : f32 to vector<128x128xf32>
    %49 = arith.select %47, %34, %48 : vector<128x128xi1>, vector<128x128xf32>
    %c0_i32 = arith.constant 0 : i32
    %50 = arith.cmpi eq, %arg1, %c0_i32 : i32
    %51 = arith.extui %50 : i1 to i32
    %c0_i32_17 = arith.constant 0 : i32
    %52 = arith.cmpi ne, %51, %c0_i32_17 : i32
    scf.if %52 {
      %c0_21 = arith.constant 0 : index
      %c0_22 = arith.constant 0 : index
      %59 = vector.load %arg8[%c0_21, %c0_22] : memref<128x128xf32, #tpu.memory_space<vmem>>, vector<128x128xf32>
      tpu.vector_store %arg8[%c0_21, %c0_22], %49 {strides = array<i32>} : memref<128x128xf32, #tpu.memory_space<vmem>>, vector<128x128xf32>,
    } else {
    }
    %c0_i32_18 = arith.constant 0 : i32
    %53 = arith.cmpi sgt, %arg1, %c0_i32_18 : i32
    %54 = arith.extui %53 : i1 to i32
    %c0_i32_19 = arith.constant 0 : i32
    %55 = arith.cmpi ne, %54, %c0_i32_19 : i32
    scf.if %55 {
      %c0_21 = arith.constant 0 : index
      %c0_22 = arith.constant 0 : index
      %59 = vector.load %arg8[%c0_21, %c0_22] : memref<128x128xf32, #tpu.memory_space<vmem>>, vector<128x128xf32>
      %60 = arith.addf %59, %49 : vector<128x128xf32>
      %c0_23 = arith.constant 0 : index
      %c0_24 = arith.constant 0 : index
      %61 = vector.load %arg8[%c0_23, %c0_24] : memref<128x128xf32, #tpu.memory_space<vmem>>, vector<128x128xf32>
      tpu.vector_store %arg8[%c0_23, %c0_24], %60 {strides = array<i32>} : memref<128x128xf32, #tpu.memory_space<vmem>>, vector<128x128xf32>,
    } else {
    }
    %c1_i32 = arith.constant 1 : i32
    %56 = arith.cmpi eq, %arg1, %c1_i32 : i32
    %57 = arith.extui %56 : i1 to i32
    %c0_i32_20 = arith.constant 0 : i32
    %58 = arith.cmpi ne, %57, %c0_i32_20 : i32
    scf.if %58 {
      %c0_21 = arith.constant 0 : index
      %c0_22 = arith.constant 0 : index
      %59 = vector.load %arg8[%c0_21, %c0_22] : memref<128x128xf32, #tpu.memory_space<vmem>>, vector<128x128xf32>
      %60 = vector.shape_cast %59 : vector<128x128xf32> to vector<1x128x128xf32>
      %cst_23 = arith.constant dense<0.000000e+00> : vector<1xf32>
      %61 = vector.multi_reduction <add>, %60, %cst_23 [1, 2] : vector<1x128x128xf32> to vector<1xf32>
      %62 = vector.shape_cast %61 : vector<1xf32> to vector<1x1x1xf32>
      %63 = vector.extract %62[0, 0, 0] : f32 from vector<1x1x1xf32>
      %64 = vector.broadcast %63 : f32 to vector<1x1x1xf32>
      %c0_24 = arith.constant 0 : index
      %c0_25 = arith.constant 0 : index
      %c0_26 = arith.constant 0 : index
      %65 = vector.load %arg7[%c0_24, %c0_25, %c0_26] : memref<1x1x1xf32, #tpu.memory_space<vmem>>, vector<1x1x1xf32>
      tpu.vector_store %arg7[%c0_24, %c0_25, %c0_26], %64 {strides = array<i32>} : memref<1x1x1xf32, #tpu.memory_space<vmem>>, vector<1x1x1xf32>,
    } else {
    }
    return
  }
  func.func @transform_0(%arg0: i32, %arg1: i32) -> i32 {
    %c0_i32 = arith.constant 0 : i32
    %c0_i32_0 = arith.constant 0 : i32
    return %c0_i32 : i32
  }
  func.func @transform_1(%arg0: i32, %arg1: i32) -> (i32, i32) {
    %c0_i32 = arith.constant 0 : i32
    %c0_i32_0 = arith.constant 0 : i32
    return %arg0, %c0_i32 : i32, i32
  }
  func.func @transform_2(%arg0: i32, %arg1: i32) -> (i32, i32) {
    %c0_i32 = arith.constant 0 : i32
    %c0_i32_0 = arith.constant 0 : i32
    return %c0_i32, %arg1 : i32, i32
  }
  func.func @transform_3(%arg0: i32, %arg1: i32) -> (i32, i32) {
    %c0_i32 = arith.constant 0 : i32
    %c0_i32_0 = arith.constant 0 : i32
    return %arg0, %c0_i32 : i32, i32
  }
  func.func @transform_4(%arg0: i32, %arg1: i32) -> (i32, i32) {
    %c0_i32 = arith.constant 0 : i32
    %c0_i32_0 = arith.constant 0 : i32
    return %arg1, %c0_i32 : i32, i32
  }
  func.func @transform_5(%arg0: i32, %arg1: i32) -> (i32, i32, i32) {
    %c0_i32 = arith.constant 0 : i32
    %c0_i32_0 = arith.constant 0 : i32
    %c0_i32_1 = arith.constant 0 : i32
    return %arg0, %c0_i32, %c0_i32_0 : i32, i32, i32
  }
}

</mosaic_0001>

<bundles_post_ra>
// kernel: tpu_custom_call.1
= control target key start
LH: loop header
LB: loop body
LE: loop exit
PB: predicated region body
PF: predicated region fallthrough
CT: control target
= control target key end

     0   :  { %s1708_s20 = smov 0   ;;  %s1710_s21 = smov 0   ;;  %s2572_s0 = inlined_call_operand.<no memory space> [shape: f32[1], index: 0, kind: input, shape index: {}]   ;;  %s2573_s1 = inlined_call_operand.vmem [shape: s32[256,1], index: 1, kind: input, shape index: {}]   ;;  %s2574_s2 = inlined_call_operand.vmem [shape: s32[2,256], index: 2, kind: input, shape index: {}]   ;;  %s2575_s3 = inlined_call_operand.vmem [shape: bf16[256,64], index: 3, kind: input, shape index: {}]   ;;  %s2576_s4 = inlined_call_operand.vmem [shape: bf16[256,64], index: 4, kind: input, shape index: {}]   ;;  %s2577_s5 = inlined_call_operand.vmem [shape: f32[2,1,1], index: 5, kind: output, shape index: {}]  }
   0x1   :  { %10 = sst [smem:[#allocation3]] %s2572_s0  ;;  %s1712_s22 = smov 0  }
   0x2   :  { %s1714_s23 = smov 0   ;;  %s1716_s24 = smov 0  }
   0x3 LB: > { %s25_s0 = sadd.s32 1, %s1663_s22  ;;  %s28_s25 = sadd.s32 1, %s1667_s23  ;;  %s1671_s24 = sphi %s1716_s24, %s16_s24   ;;  %s1667_s23 = sphi %s1714_s23, %s2707_s23   ;;  %s1663_s22 = sphi %s1712_s22, %s2706_s22   ;;  %s1659_s21 = sphi %s1710_s21, %s2705_s21   ;;  %s1655_s20 = sphi %s1708_s20, %s2704_s20  }
   0x4   : > { %p26_p0 = scmp.ge.s32.totalorder %s25_s0, 2  ;;  %p1370_p1 = scmp.ge.s32.totalorder %s1671_s24, 1 }
   0x5   : > { %p232_p2 = scmp.lt.s32.totalorder %s1671_s24, 5 }
   0x6   : > { %s2709_s0 = smov (%p26_p0, %s25_s0), 0  ;;  %s2711_s25 = smov (!%p26_p0, %s28_s25), %s1667_s23 }
   0x7   : > { %p233_p3 = pnand %p1370_p1, %p232_p2  ;;  %p30_p4 = scmp.ge.s32.totalorder %s2711_s25, 2 }
   0x9   : > { %s2713_s25 = smov (%p30_p4, %s2711_s25), 0  ;;  %236 = sbr.rel (%p233_p3) target bundleno = 655 (0x28f), region = 40 }
  0x10   : > { %s1376_s26 = sshll.u32 %s1655_s20, 4  ;;  %p294_p5 = scmp.lt.s32.totalorder %s1659_s21, 1  ;;  %v1673_v0 = vmov 0   ;;  %vm410_vm0 = vcmask 523264   ;;  %v2578_v55 = vmov 0.0  }
  0x11   : > { %p289_p6 = scmp.lt.s32.totalorder %s1376_s26, 31  ;;  %1551 = vset.pattern.permute.xlu0 %v1673_v0  ;;  %1552 = vset.pattern.permute.xlu1 %v1673_v0  ;;  %s1371_s6 = sshll.u32 %s1659_s21, 4 }
  0x12   : > { %s1745_s27 = scalar_select %p294_p5, %s1659_s21, 1 }
  0x13   : > { %s2715_s26 = smov (!%p289_p6, %s1376_s26), 31  ;;  %p273_p7 = scmp.lt.s32.totalorder %s1371_s6, 31 }
  0x14   : > { %s296_s30 = scalar_lea.vmem %s2577_s5, %s1745_s27  ;;  %s1377_s7 = sshll.u32 %s2715_s26, 2 }
  0x15   : > { %s1755_s10 = scalar_lea.vmem %s2576_s4, %s1377_s7  ;;  %s2717_s6 = smov (!%p273_p7, %s1371_s6), 31 }
  0x16   : > { %v1553_v1 = vld [vmem:[%s1755_s10] sm:$0xff]   ;;  %v1554_v2 = vld [vmem:[%s1755_s10 + $0x8] sm:$0xff]   ;;  %v1555_v5 = vld [vmem:[%s1755_s10 + $0x10] sm:$0xff]   ;;  %s1375_s11 = sshll.u32 %s2717_s6, 2  ;;  %s1372_s15 = sshll.u32 %s2717_s6, 3 }
  0x17   : > { %1491 = vmatprep.subr.msk.bf16.mxu0 %vm410_vm0, %v1553_v1  ;;  %1492 = vmatprep.subr.msk.bf16.mxu1 %vm410_vm0, %v1553_v1  ;;  %v436_v3 = vsel %vm410_vm0, %v1553_v1, 0  ;;  %v439_v4 = vsel %vm410_vm0, %v1554_v2, 0  ;;  %s1769_s14 = scalar_lea.vmem %s2575_s3, %s1375_s11  ;;  %s1780_s18 = scalar_lea.vmem %s2573_s1, %s1372_s15  ;;  %v442_v8 = vsel %vm410_vm0, %v1555_v5, 0  ;;  %v1556_v9 = vld [vmem:[%s1755_s10 + $0x18] sm:$0xff]   ;;  %v1557_v15 = vld [vmem:[%s1755_s10 + $0x20] sm:$0xff]   ;;  %v1558_v21 = vld [vmem:[%s1755_s10 + $0x28] sm:$0xff]  }
  0x18   : > { %1444 = vmatpush3.bf16.xpose.msra.mxu0 %v436_v3  ;;  %1483 = vmatpush3.bf16.xpose.msra.mxu1 %v436_v3  ;;  %v1561_v6 = vld [vmem:[%s1769_s14] sm:$0xff]   ;;  %v576_v11 = vld [vmem:[%s1780_s18 + $0x10] sm:$0xff]  ;;  %v575_v12 = vld [vmem:[%s1780_s18 + $0x8] sm:$0xff]  ;;  %v445_v14 = vsel %vm410_vm0, %v1556_v9, 0  ;;  %v448_v20 = vsel %vm410_vm0, %v1557_v15, 0  ;;  %v451_v26 = vsel %vm410_vm0, %v1558_v21, 0 }
  0x19   : > { %1493 = vmatprep.subr.msk.bf16.mxu0 %vm410_vm0, %v1554_v2  ;;  %1494 = vmatprep.subr.msk.bf16.mxu1 %vm410_vm0, %v1554_v2  ;;  %v1562_v7 = vld [vmem:[%s1769_s14 + $0x20] sm:$0xff]   ;;  %v577_v13 = vld [vmem:[%s1780_s18 + $0x18] sm:$0xff]  ;;  %v579_v17 = vld [vmem:[%s1780_s18 + $0x28] sm:$0xff]  ;;  %p278_p8 = scmp.lt.s32.totalorder %s1655_s20, 1  ;;  %s1852_s7 = sld [smem:[#allocation3]]  ;;  %v1064_v2 = vlaneseq }
  0x1a   : > { %1459 = vmatprep.mubr.msk.bf16.mxu0 %vm410_vm0, %v1561_v6  ;;  %1467 = vmatprep.mubr.msk.bf16.mxu1 %vm410_vm0, %v1562_v7  ;;  %v574_v10 = vld [vmem:[%s1780_s18] sm:$0xff]  ;;  %v580_v18 = vld [vmem:[%s1780_s18 + $0x30] sm:$0xff]  ;;  %v581_v19 = vld [vmem:[%s1780_s18 + $0x38] sm:$0xff]  ;;  %s1420_s8 = sshll.u32 %s1659_s21, 7  ;;  %s1421_s9 = sshll.u32 %s1655_s20, 7 }
  0x1b   : > { %592 = vperm.xlu0 %1551, %v574_v10   ;;  %598 = vperm.xlu1 %1552, %v576_v11   ;;  %v578_v16 = vld [vmem:[%s1780_s18 + $0x20] sm:$0xff]  ;;  %v583_v23 = vld [vmem:[%s1780_s18 + $0x48] sm:$0xff]  ;;  %v584_v24 = vld [vmem:[%s1780_s18 + $0x50] sm:$0xff]  ;;  %s279_s19 = scalar_select %p278_p8, %s1655_s20, 1 }
  0x1c   : > { %v582_v22 = vld [vmem:[%s1780_s18 + $0x40] sm:$0xff]  ;;  %v585_v25 = vld [vmem:[%s1780_s18 + $0x58] sm:$0xff]  ;;  %v1559_v27 = vld [vmem:[%s1755_s10 + $0x30] sm:$0xff]   ;;  %p1422_p9 = scmp.ne.s32.totalorder %s1655_s20, 0 }
  0x1d   : > { %v586_v28 = vld [vmem:[%s1780_s18 + $0x60] sm:$0xff]  ;;  %v587_v29 = vld [vmem:[%s1780_s18 + $0x68] sm:$0xff]  ;;  %v588_v30 = vld [vmem:[%s1780_s18 + $0x70] sm:$0xff]  ;;  %v454_v32 = vsel %vm410_vm0, %v1559_v27, 0  ;;  %s1373_s26 = sshll.u32 %s279_s19, 1 }
  0x1e   : > { %v589_v31 = vld [vmem:[%s1780_s18 + $0x78] sm:$0xff]  ;;  %v1563_v35 = vld [vmem:[%s1769_s14 + $0x8] sm:$0xff]   ;;  %v1565_v37 = vld [vmem:[%s1769_s14 + $0x10] sm:$0xff]   ;;  %s281_s6 = scalar_lea.vmem %s2574_s2, %s1373_s26 }
  0x1f   : > { %595 = vperm.xlu0 %1551, %v575_v12   ;;  %601 = vperm.xlu1 %1552, %v577_v13   ;;  %v1560_v33 = vld [vmem:[%s1755_s10 + $0x38] sm:$0xff]   ;;  %v1564_v36 = vld [vmem:[%s1769_s14 + $0x28] sm:$0xff]   ;;  %v1566_v38 = vld [vmem:[%s1769_s14 + $0x30] sm:$0xff]   ;;  %v1917_v10 = vstv %s1852_s7 }
  0x20   : > { %1446 = vmatpush3.bf16.xpose.msra.mxu0 %v439_v4  ;;  %1484 = vmatpush3.bf16.xpose.msra.mxu1 %v439_v4  ;;  %v457_v34 = vsel %vm410_vm0, %v1560_v33, 0  ;;  %v1567_v39 = vld [vmem:[%s1769_s14 + $0x18] sm:$0xff]   ;;  %v1840_v49 = vld [vmem:[%s281_s6] ss:$0 sm:$0xff]  ;;  %v1842_v50 = vld [vmem:[%s281_s6 + $0x1] ss:$0 sm:$0xff] }
  0x21   : > { %1495 = vmatprep.subr.msk.bf16.mxu0 %vm410_vm0, %v1555_v5  ;;  %1496 = vmatprep.subr.msk.bf16.mxu1 %vm410_vm0, %v1555_v5  ;;  %v1568_v40 = vld [vmem:[%s1769_s14 + $0x38] sm:$0xff]   ;;  %2608 = vst [vmem:[#allocation4_spill] sm:$0xff] %v1917_v10 }
  0x23   : > { %604 = vperm.xlu0 %1551, %v578_v16   ;;  %607 = vperm.xlu1 %1552, %v579_v17  }
  0x27   : > { %610 = vperm.xlu0 %1551, %v580_v18   ;;  %613 = vperm.xlu1 %1552, %v581_v19   ;;  %v1938_v18 = vshrl.u32 %v1064_v2, 7 }
  0x28   : > { %1448 = vmatpush3.bf16.xpose.msra.mxu0 %v442_v8  ;;  %1485 = vmatpush3.bf16.xpose.msra.mxu1 %v442_v8 }
  0x29   : > { %1497 = vmatprep.subr.msk.bf16.mxu0 %vm410_vm0, %v1556_v9  ;;  %1498 = vmatprep.subr.msk.bf16.mxu1 %vm410_vm0, %v1556_v9  ;;  %2609 = vst [vmem:[#allocation5_spill] sm:$0xff] %v1938_v18 }
  0x2b   : > { %616 = vperm.xlu0 %1551, %v582_v22   ;;  %619 = vperm.xlu1 %1552, %v583_v23  }
  0x2f   : > { %622 = vperm.xlu0 %1551, %v584_v24   ;;  %625 = vperm.xlu1 %1552, %v585_v25  }
  0x30   : > { %1450 = vmatpush3.bf16.xpose.msra.mxu0 %v445_v14  ;;  %1486 = vmatpush3.bf16.xpose.msra.mxu1 %v445_v14 }
  0x31   : > { %1499 = vmatprep.subr.msk.bf16.mxu0 %vm410_vm0, %v1557_v15  ;;  %1500 = vmatprep.subr.msk.bf16.mxu1 %vm410_vm0, %v1557_v15 }
  0x33   : > { %628 = vperm.xlu0 %1551, %v586_v28   ;;  %631 = vperm.xlu1 %1552, %v587_v29  }
  0x37   : > { %634 = vperm.xlu0 %1551, %v588_v30   ;;  %637 = vperm.xlu1 %1552, %v589_v31  }
  0x38   : > { %1452 = vmatpush3.bf16.xpose.msra.mxu0 %v448_v20  ;;  %1487 = vmatpush3.bf16.xpose.msra.mxu1 %v448_v20 }
  0x39   : > { %1501 = vmatprep.subr.msk.bf16.mxu0 %vm410_vm0, %v1558_v21  ;;  %1502 = vmatprep.subr.msk.bf16.mxu1 %vm410_vm0, %v1558_v21 }
  0x40   : > { %1454 = vmatpush3.bf16.xpose.msra.mxu0 %v451_v26  ;;  %1488 = vmatpush3.bf16.xpose.msra.mxu1 %v451_v26 }
  0x41   : > { %1503 = vmatprep.subr.msk.bf16.mxu0 %vm410_vm0, %v1559_v27  ;;  %1504 = vmatprep.subr.msk.bf16.mxu1 %vm410_vm0, %v1559_v27 }
  0x48   : > { %1456 = vmatpush3.bf16.xpose.msra.mxu0 %v454_v32  ;;  %1489 = vmatpush3.bf16.xpose.msra.mxu1 %v454_v32 }
  0x49   : > { %1505 = vmatprep.subr.msk.bf16.mxu0 %vm410_vm0, %v1560_v33  ;;  %1506 = vmatprep.subr.msk.bf16.mxu1 %vm410_vm0, %v1560_v33 }
  0x50   : > { %1458 = vmatpush3.bf16.xpose.msra.mxu0 %v457_v34  ;;  %1490 = vmatpush3.bf16.xpose.msra.mxu1 %v457_v34  ;;  %v1067_v34 = vadd.s32 16, %v1938_v18 }
  0x57   : > { %1460 = vmatmul.mubr.msk.bf16.vlgmr.msra.gmra.mrb[0].mxu0 %vm410_vm0, %v1563_v35  ;;  %1468 = vmatmul.mubr.msk.bf16.vlgmr.msra.gmra.mrb[0].mxu1 %vm410_vm0, %v1564_v36 }
  0x58   : > { %1463 = vmatprep.mubr.msk.bf16.mxu0 %vm410_vm0, %v1565_v37  ;;  %1471 = vmatprep.mubr.msk.bf16.mxu1 %vm410_vm0, %v1566_v38  ;;  %v1971_v37 = vstv %s1420_s8  ;;  %v1100_v38 = vand.u32 127, %v1064_v2 }
  0x59   : > { %2617 = vst [vmem:[#allocation13_spill] sm:$0xff] %v1971_v37  ;;  %v1989_v53 = vadd.s32 %v1971_v37, %v1067_v34 }
  0x5f   : > { %1464 = vmatmul.mubr.msk.bf16.gmra.mrb[4].mxu0 %vm410_vm0, %v1567_v39  ;;  %1472 = vmatmul.mubr.msk.bf16.gmra.mrb[4].mxu1 %vm410_vm0, %v1568_v40  ;;  %v1102_v40 = vstv %s1421_s9 }
  0x9a   : > { %v593_v41 = vpop.permute.xlu0 %592  ;;  %v599_v42 = vpop.permute.xlu1 %598 }
  0x9b   : > { %vm643_vm1 = vcmp.eq.s32.totalorder %v593_v41, %v1840_v49  ;;  %vm664_vm2 = vcmp.eq.s32.totalorder %v593_v41, %v1842_v50  ;;  %vm645_vm3 = vcmp.eq.s32.totalorder %v599_v42, %v1840_v49  ;;  %vm666_vm4 = vcmp.eq.s32.totalorder %v599_v42, %v1842_v50 }
  0x9c   : > { %vm680_vm7 = vmor %vm643_vm1, %vm664_vm2  ;;  %v1075_v41 = vadd.s32 80, %v1938_v18  ;;  %v1073_v42 = vadd.s32 64, %v1938_v18 }
  0x9d   : > { %vm682_vm10 = vmor %vm645_vm3, %vm666_vm4  ;;  %v1404_v56 = vsel %vm680_vm7, 1.0, %v2578_v55 }
  0x9e   : > { %v596_v43 = vpop.permute.xlu0 %595  ;;  %v602_v44 = vpop.permute.xlu1 %601  ;;  %v968_v58 = vmul.f32 19.0, %v1404_v56  ;;  %v1406_v59 = vsel %vm682_vm10, 1.0, %v2578_v55  ;;  %v1906_v7 = vmul.f32 20.0, %v1404_v56  ;;  %v2006_v2 = vadd.s32 %v1971_v37, %v1075_v41 }
  0x9f   : > { %vm644_vm5 = vcmp.eq.s32.totalorder %v596_v43, %v1840_v49  ;;  %vm665_vm6 = vcmp.eq.s32.totalorder %v596_v43, %v1842_v50  ;;  %vm646_vm8 = vcmp.eq.s32.totalorder %v602_v44, %v1840_v49  ;;  %vm667_vm9 = vcmp.eq.s32.totalorder %v602_v44, %v1842_v50 }
  0xa0   : > { %vm1856_vm13 = vmor %vm644_vm5, %vm665_vm6  ;;  %v970_v61 = vmul.f32 19.0, %v1406_v59  ;;  %v1904_v6 = vadd.f32 1.0, %v968_v58  ;;  %v1908_v8 = vmul.f32 20.0, %v1406_v59  ;;  %v1068_v58 = vadd.s32 24, %v1938_v18 }
  0xa1   : > { %vm683_vm0 = vmor %vm646_vm8, %vm667_vm9  ;;  %v1405_v62 = vsel %vm1856_vm13, 1.0, %v2578_v55  ;;  %v1995_v59 = vadd.s32 %v1102_v40, %v1100_v38 }
  0xa2   : > { %v605_v45 = vpop.permute.xlu0 %604  ;;  %v1833_v46 = vpop.permute.xlu1 %607  ;;  %v1407_v0 = vsel %vm683_vm0, 1.0, %v2578_v55  ;;  %v969_v3 = vmul.f32 19.0, %v1405_v62  ;;  %v1919_v11 = vadd.f32 1.0, %v970_v61  ;;  %v1921_v12 = vmul.f32 20.0, %v1405_v62 }
  0xa3   : > { %vm647_vm11 = vcmp.eq.s32.totalorder %v605_v45, %v1840_v49  ;;  %vm668_vm12 = vcmp.eq.s32.totalorder %v605_v45, %v1842_v50  ;;  %v971_v4 = vmul.f32 19.0, %v1407_v0  ;;  %vm669_vm13 = vcmp.eq.s32.totalorder %v1833_v46, %v1842_v50 }
  0xa4   : > { %vm1866_vm3 = vmor %vm647_vm11, %vm668_vm12  ;;  %vm648_vm12 = vcmp.eq.s32.totalorder %v1833_v46, %v1840_v49  ;;  %v1923_v13 = vmul.f32 20.0, %v1407_v0  ;;  %v1940_v19 = vadd.f32 1.0, %v969_v3  ;;  %v1076_v0 = vadd.s32 88, %v1938_v18 }
  0xa5   : > { %v1408_v15 = vsel %vm1866_vm3, 1.0, %v2578_v55  ;;  %v1942_v20 = vadd.f32 1.0, %v971_v4  ;;  %v2010_v3 = vadd.s32 %v1971_v37, %v1938_v18  ;;  %v2013_v4 = vadd.s32 %v1971_v37, %v1073_v42 }
  0xa6   : > { %v611_v47 = vpop.permute.xlu0 %610  ;;  %v1838_v48 = vpop.permute.xlu1 %613  ;;  %2610 = vst [vmem:[#allocation6_spill] sm:$0xff] %v1940_v19  ;;  %v1947_v23 = vmul.f32 19.0, %v1408_v15  ;;  %v1954_v27 = vmul.f32 20.0, %v1408_v15  ;;  %v2028_v34 = vadd.s32 %v1971_v37, %v1076_v0 }
  0xa7   : > { %vm649_vm14 = vcmp.eq.s32.totalorder %v611_v47, %v1840_v49  ;;  %vm670_vm15 = vcmp.eq.s32.totalorder %v611_v47, %v1842_v50 }
  0xa8   : > { %vm1879_vm6 = vmor %vm649_vm14, %vm670_vm15  ;;  %2611 = vst [vmem:[#allocation7_spill] sm:$0xff] %v1947_v23 }
  0xa9   : > { %v1410_v14 = vsel %vm1879_vm6, 1.0, %v2578_v55  ;;  %2612 = vst [vmem:[#allocation8_spill] sm:$0xff] %v1954_v27  ;;  %vm1114_vm6 = vcmp.lt.s32.totalorder %v2006_v2, 200 }
  0xaa   : > { %v617_v51 = vpop.permute.xlu0 %616  ;;  %v620_v52 = vpop.permute.xlu1 %619  ;;  %v974_v16 = vmul.f32 19.0, %v1410_v14  ;;  %v1962_v32 = vmul.f32 20.0, %v1410_v14 }
  0xab   : > { %vm651_vm1 = vcmp.eq.s32.totalorder %v617_v51, %v1840_v49  ;;  %vm672_vm2 = vcmp.eq.s32.totalorder %v617_v51, %v1842_v50  ;;  %vm652_vm4 = vcmp.eq.s32.totalorder %v620_v52, %v1840_v49  ;;  %vm673_vm5 = vcmp.eq.s32.totalorder %v620_v52, %v1842_v50 }
  0xac   : > { %vm1886_vm9 = vmor %vm651_vm1, %vm672_vm2  ;;  %v1960_v31 = vadd.f32 1.0, %v974_v16  ;;  %2615 = vst [vmem:[#allocation11_spill] sm:$0xff] %v1962_v32  ;;  %v1066_v16 = vadd.s32 8, %v1938_v18 }
  0xad   : > { %vm1900_vm14 = vmor %vm652_vm4, %vm673_vm5  ;;  %v1412_v17 = vsel %vm1886_vm9, 1.0, %v2578_v55  ;;  %vm1106_vm4 = vcmp.lt.s32.totalorder %v1989_v53, 200  ;;  %vm1120_vm5 = vcmp.lt.s32.totalorder %v1995_v59, 200 }
  0xae   : > { %v623_v54 = vpop.permute.xlu0 %622  ;;  %v626_v57 = vpop.permute.xlu1 %625  ;;  %vm685_vm1 = vmor %vm648_vm12, %vm669_vm13  ;;  %v976_v21 = vmul.f32 19.0, %v1412_v17  ;;  %v1413_v22 = vsel %vm1900_vm14, 1.0, %v2578_v55  ;;  %2614 = vst [vmem:[#allocation10_spill] sm:$0xff] %v1960_v31  ;;  %v1964_v33 = vmul.f32 20.0, %v1412_v17  ;;  %v1074_v17 = vadd.s32 72, %v1938_v18 }
  0xaf   : > { %vm653_vm7 = vcmp.eq.s32.totalorder %v623_v54, %v1840_v49  ;;  %vm674_vm8 = vcmp.eq.s32.totalorder %v623_v54, %v1842_v50  ;;  %vm654_vm10 = vcmp.eq.s32.totalorder %v626_v57, %v1840_v49  ;;  %vm675_vm11 = vcmp.eq.s32.totalorder %v626_v57, %v1842_v50 }
  0xb0   : > { %vm1912_vm15 = vmor %vm653_vm7, %vm674_vm8  ;;  %v977_v24 = vmul.f32 19.0, %v1413_v22  ;;  %v1957_v28 = vsel %vm685_vm1, 1.0, %v2578_v55  ;;  %v1967_v35 = vadd.f32 1.0, %v976_v21  ;;  %v1969_v36 = vmul.f32 20.0, %v1413_v22 }
  0xb1   : > { %vm691_vm0 = vmor %vm654_vm10, %vm675_vm11  ;;  %v1414_v25 = vsel %vm1912_vm15, 1.0, %v2578_v55  ;;  %2613 = vst [vmem:[#allocation9_spill] sm:$0xff] %v1957_v28  ;;  %vm1104_vm8 = vcmp.lt.s32.totalorder %v2010_v3, 200  ;;  %vm1112_vm10 = vcmp.lt.s32.totalorder %v2013_v4, 200  ;;  %vm1115_vm14 = vcmp.lt.s32.totalorder %v2028_v34, 200 }
  0xb2   : > { %v1415_v26 = vsel %vm691_vm0, 1.0, %v2578_v55  ;;  %v978_v29 = vmul.f32 19.0, %v1414_v25  ;;  %2616 = vst [vmem:[#allocation12_spill] sm:$0xff] %v1969_v36  ;;  %v1973_v39 = vadd.f32 1.0, %v977_v24  ;;  %v1979_v44 = vmul.f32 20.0, %v1414_v25 }
  0xb3   : > { %v979_v30 = vmul.f32 19.0, %v1415_v26  ;;  %v1983_v46 = vmul.f32 20.0, %v1415_v26  ;;  %v2021_v24 = vadd.s32 %v1971_v37, %v1068_v58  ;;  %v1071_v25 = vadd.s32 48, %v1938_v18 }
  0xb4   : > { %2618 = vst [vmem:[#allocation14_spill] sm:$0xff] %v1973_v39  ;;  %v1977_v43 = vadd.f32 1.0, %v978_v29  ;;  %vm650_vm0 = vcmp.eq.s32.totalorder %v1838_v48, %v1840_v49  ;;  %vm671_vm1 = vcmp.eq.s32.totalorder %v1838_v48, %v1842_v50 }
  0xb5   : > { %v1981_v45 = vadd.f32 1.0, %v979_v30  ;;  %vm1107_vm12 = vcmp.lt.s32.totalorder %v2021_v24, 200 }
  0xb7   : > { %2619 = vst [vmem:[#allocation15_spill] sm:$0xff] %v1981_v45 }
 0x12a   : > { %v1461_v47 = vpop.f32.mrb[0].mxu0  ;;  %v1469_v51 = vpop.f32.mrb[0].mxu1 }
 0x12b   : > { %v1986_v52 = vmul.f32 %v1461_v47, %v1917_v10  ;;  %v1992_v54 = vmul.f32 %v1469_v51, %v1917_v10  ;;  %v493_v56 = vpop.f32.mrb[1].mxu0  ;;  %v525_v57 = vpop.f32.mrb[1].mxu1 }
 0x12c   : > { %v1998_v60 = vmul.f32 %v1917_v10, %v493_v56  ;;  %v2001_v61 = vmul.f32 %v1917_v10, %v525_v57  ;;  %v1462_v62 = vpop.f32.mrb[2].mxu0  ;;  %v1470_v63 = vpop.f32.mrb[2].mxu1  ;;  %v2037_v56 = vadd.s32 %v1971_v37, %v1066_v16  ;;  %v2040_v57 = vadd.s32 %v1971_v37, %v1074_v17 }
 0x12d   : > { %v746_v1 = vand.u32 2147483647, %v1986_v52  ;;  %v496_v5 = vpop.f32.mrb[3].mxu0  ;;  %v528_v9 = vpop.f32.mrb[3].mxu1  ;;  %v754_v14 = vand.u32 2147483647, %v1992_v54  ;;  %v2025_v30 = vmul.f32 %v1462_v62, %v1917_v10  ;;  %v2031_v41 = vmul.f32 %v1470_v63, %v1917_v10 }
 0x12e   : > { %v744_v15 = vand.u32 2147483647, %v1998_v60  ;;  %v752_v22 = vand.u32 2147483647, %v2001_v61  ;;  %v2034_v42 = vmul.f32 %v1917_v10, %v496_v5  ;;  %v2083_v27 = vmul.f32 %v1964_v33, %v2001_v61 }
 0x12f   : > { %v762_v21 = vsub.f32 0.0, %v746_v1  ;;  %v770_v26 = vsub.f32 0.0, %v754_v14  ;;  %v747_v0 = vand.u32 2147483647, %v2025_v30  ;;  %v2044_v1 = vadd.s32 %v1971_v37, %v1071_v25 }
 0x130   : > { %v760_v29 = vsub.f32 0.0, %v744_v15  ;;  %v768_v40 = vsub.f32 0.0, %v752_v22  ;;  %2620 = vst [vmem:[#allocation16_spill] sm:$0xff] %v2034_v42  ;;  %v2049_v14 = vmul.f32 %v1908_v8, %v1986_v52  ;;  %v755_v15 = vand.u32 2147483647, %v2031_v41 }
 0x131   : > { %v780_v38 = vmul.f32 1.442695, %v762_v21  ;;  %v796_v47 = vmul.f32 1.442695, %v770_v26  ;;  %v763_v22 = vsub.f32 0.0, %v747_v0  ;;  %v2061_v8 = vmul.f32 %v1917_v10, %v528_v9 }
 0x132   : > { %v776_v51 = vmul.f32 1.442695, %v760_v29  ;;  %v1465_v58 = vpop.f32.mrb[4].mxu0  ;;  %v792_v62 = vmul.f32 1.442695, %v768_v40  ;;  %v1473_v63 = vpop.f32.mrb[4].mxu1 }
 0x133   : > { %1569 = vpow2.f32 %v780_v38  ;;  %v509_v16 = vpop.f32.mrb[5].mxu0  ;;  %v2052_v17 = vpop.f32.mrb[5].mxu1  ;;  %v745_v25 = vand.u32 2147483647, %v2034_v42  ;;  %v771_v38 = vsub.f32 0.0, %v755_v15  ;;  %2622 = vst [vmem:[#allocation18_spill] sm:$0xff] %v2061_v8  ;;  %v2064_v40 = vmul.f32 %v1465_v58, %v1917_v10 }
 0x134   : > { %1571 = vpow2.f32 %v796_v47  ;;  %v2056_v26 = vpop.f32.mrb[6].mxu0  ;;  %v2058_v29 = vpop.f32.mrb[6].mxu1  ;;  %v782_v21 = vmul.f32 1.442695, %v763_v22  ;;  %v753_v15 = vand.u32 2147483647, %v2061_v8  ;;  %v2095_v33 = vmul.f32 %v1917_v10, %v509_v16 }
 0x135   : > { %1573 = vpow2.f32 %v776_v51  ;;  %2621 = vst [vmem:[#allocation17_spill] sm:$0xff] %v2058_v29  ;;  %2623 = vst [vmem:[#allocation19_spill] sm:$0xff] %v2064_v40  ;;  %v2066_v47 = vpop.f32.mrb[7].mxu0  ;;  %v2068_v55 = vpop.f32.mrb[7].mxu1  ;;  %v2072_v51 = vmul.f32 %v1979_v44, %v1992_v54  ;;  %v761_v5 = vsub.f32 0.0, %v745_v25  ;;  %v2105_v22 = vmul.f32 %v1921_v12, %v2034_v42 }
 0x136   : > { %1575 = vpow2.f32 %v792_v62  ;;  %2624 = vst [vmem:[#allocation20_spill] sm:$0xff] %v2066_v47  ;;  %2625 = vst [vmem:[#allocation21_spill] sm:$0xff] %v2068_v55  ;;  %v2077_v62 = vmul.f32 %v1906_v7, %v1998_v60  ;;  %v798_v58 = vmul.f32 1.442695, %v771_v38  ;;  %v750_v37 = vand.u32 2147483647, %v2064_v40 }
 0x137   : > { %1577 = vpow2.f32 %v782_v21  ;;  %v778_v44 = vmul.f32 1.442695, %v761_v5  ;;  %v769_v25 = vsub.f32 0.0, %v753_v15  ;;  %v2088_v7 = vmul.f32 %v1473_v63, %v1917_v10  ;;  %2629 = vst [vmem:[#allocation25_spill] sm:$0xff] %v2105_v22  ;;  %v2665_v24 = vld [vmem:[#allocation16_spill] sm:$0xff] }
 0x138   : > { %1579 = vpow2.f32 %v798_v58  ;;  %v2092_v38 = vmul.f32 %v1923_v13, %v2025_v30  ;;  %v766_v9 = vsub.f32 0.0, %v750_v37  ;;  %v2100_v21 = vmul.f32 %v1983_v46, %v2031_v41 }
 0x139   : > { %2626 = vst [vmem:[#allocation22_spill] sm:$0xff] %v2088_v7  ;;  %1581 = vpow2.f32 %v778_v44  ;;  %v794_v15 = vmul.f32 1.442695, %v769_v25  ;;  %v758_v46 = vand.u32 2147483647, %v2088_v7  ;;  %v2115_v7 = vmul.f32 %v1917_v10, %v2052_v17 }
 0x13a   : > { %2627 = vst [vmem:[#allocation23_spill] sm:$0xff] %v2092_v38  ;;  %2628 = vst [vmem:[#allocation24_spill] sm:$0xff] %v2100_v21  ;;  %v788_v16 = vmul.f32 1.442695, %v766_v9 }
 0x13b   : > { %1583 = vpow2.f32 %v794_v15  ;;  %v2111_v15 = vsub.f32 0.0, %v758_v46  ;;  %2630 = vst [vmem:[#allocation26_spill] sm:$0xff] %v2115_v7 }
 0x13c   : > { %1585 = vpow2.f32 %v788_v16 }
 0x13d   : > { %v1570_v63 = vpop.eup %1569  ;;  %v2692_v34 = vld [vmem:[#allocation21_spill] sm:$0xff] }
 0x13e   : > { %v1572_v44 = vpop.eup %1571  ;;  %v826_v0 = vadd.f32 1.0, %v1570_v63  ;;  %v829_v5 = vmul.f32 -0.5, %v1570_v63  ;;  %v832_v12 = vand.u32 2147483647, %v1570_v63 }
 0x13f   : > { %v1574_v18 = vpop.eup %1573  ;;  %v898_v23 = vadd.f32 1.0, %v1572_v44  ;;  %v901_v58 = vmul.f32 -0.5, %v1572_v44  ;;  %v904_v47 = vand.u32 2147483647, %v1572_v44 }
 0x140   : > { %v1576_v55 = vpop.eup %1575  ;;  %1587 = vlog2.f32 %v826_v0  ;;  %v808_v13 = vadd.f32 1.0, %v1574_v18  ;;  %v830_v29 = vadd.f32 1.0, %v829_v5  ;;  %v811_v37 = vmul.f32 -0.5, %v1574_v18 }
 0x141   : > { %1589 = vlog2.f32 %v898_v23  ;;  %v902_v9 = vadd.f32 1.0, %v901_v58  ;;  %v880_v28 = vadd.f32 1.0, %v1576_v55  ;;  %v1578_v16 = vpop.eup %1577  ;;  %v814_v25 = vand.u32 2147483647, %v1574_v18 }
 0x142   : > { %1591 = vlog2.f32 %v808_v13  ;;  %v812_v31 = vadd.f32 1.0, %v811_v37  ;;  %v883_v32 = vmul.f32 -0.5, %v1576_v55  ;;  %v2119_v0 = vmul.f32 %v2056_v26, %v1917_v10  ;;  %v1580_v5 = vpop.eup %1579 }
 0x143   : > { %vm2121_vm2 = vcmp.lt.f32.partialorder %v832_v12, 0.0004427343  ;;  %1593 = vlog2.f32 %v880_v28  ;;  %v835_v58 = vadd.f32 1.0, %v1578_v16  ;;  %v838_v13 = vmul.f32 -0.5, %v1578_v16  ;;  %v1582_v46 = vpop.eup %1581 }
 0x144   : > { %2631 = vst [vmem:[#allocation27_spill] sm:$0xff] %v2119_v0  ;;  %v831_v40 = vmul.f32 %v1570_v63, %v830_v29  ;;  %v903_v17 = vmul.f32 %v1572_v44, %v902_v9  ;;  %vm2125_vm3 = vcmp.lt.f32.partialorder %v904_v47, 0.0004427343  ;;  %v884_v37 = vadd.f32 1.0, %v883_v32 }
 0x145   : > { %v886_v22 = vand.u32 2147483647, %v1576_v55  ;;  %1595 = vlog2.f32 %v835_v58  ;;  %v841_v26 = vand.u32 2147483647, %v1578_v16  ;;  %v907_v12 = vadd.f32 1.0, %v1580_v5  ;;  %v1584_v44 = vpop.eup %1583 }
 0x146   : > { %v910_v10 = vmul.f32 -0.5, %v1580_v5  ;;  %v813_v28 = vmul.f32 %v1574_v18, %v812_v31  ;;  %vm2132_vm7 = vcmp.lt.f32.partialorder %v814_v25, 0.0004427343  ;;  %v839_v47 = vadd.f32 1.0, %v838_v13  ;;  %v2137_v58 = vpop.eup %1585 }
 0x147   : > { %v817_v63 = vadd.f32 1.0, %v1582_v46  ;;  %1597 = vlog2.f32 %v907_v12  ;;  %v913_v9 = vand.u32 2147483647, %v1580_v5  ;;  %v820_v0 = vmul.f32 -0.5, %v1582_v46 }
 0x148   : > { %v911_v32 = vadd.f32 1.0, %v910_v10  ;;  %v885_v36 = vmul.f32 %v1576_v55, %v884_v37  ;;  %vm2139_vm9 = vcmp.lt.f32.partialorder %v886_v22, 0.0004427343  ;;  %v889_v18 = vadd.f32 1.0, %v1584_v44 }
 0x149   : > { %1599 = vlog2.f32 %v817_v63  ;;  %vm2144_vm11 = vcmp.lt.f32.partialorder %v841_v26, 0.0004427343  ;;  %v821_v13 = vadd.f32 1.0, %v820_v0  ;;  %v823_v10 = vand.u32 2147483647, %v1582_v46 }
 0x14a   : > { %v1588_v31 = vpop.eup %1587  ;;  %v892_v12 = vmul.f32 -0.5, %v1584_v44  ;;  %v840_v7 = vmul.f32 %v1578_v16, %v839_v47  ;;  %1601 = vlog2.f32 %v889_v18  ;;  %v862_v55 = vadd.f32 1.0, %v2137_v58 }
 0x14b   : > { %v1590_v19 = vpop.eup %1589  ;;  %v828_v21 = vmul.f32 0.6931472, %v1588_v31  ;;  %v912_v63 = vmul.f32 %v1580_v5, %v911_v32  ;;  %vm2150_vm13 = vcmp.lt.f32.partialorder %v913_v9, 0.0004427343  ;;  %v895_v45 = vand.u32 2147483647, %v1584_v44 }
 0x14c   : > { %v1592_v22 = vpop.eup %1591  ;;  %v900_v37 = vmul.f32 0.6931472, %v1590_v19  ;;  %v893_v26 = vadd.f32 1.0, %v892_v12  ;;  %1603 = vlog2.f32 %v862_v55  ;;  %v865_v16 = vmul.f32 -0.5, %v2137_v58 }
 0x14d   : > { %v834_v0 = vsel %vm2121_vm2, %v831_v40, %v828_v21  ;;  %v810_v38 = vmul.f32 0.6931472, %v1592_v22  ;;  %v1594_v47 = vpop.eup %1593  ;;  %v2644_v18 = vmax.f32 %v1986_v52, 0.0  ;;  %v822_v32 = vmul.f32 %v1582_v46, %v821_v13  ;;  %vm2200_vm2 = vmand %vm1114_vm6, %vm1120_vm5 }
 0x14e   : > { %v906_v5 = vsel %vm2125_vm3, %v903_v17, %v900_v37  ;;  %vm2162_vm15 = vcmp.lt.f32.partialorder %v823_v10, 0.0004427343  ;;  %v2647_v40 = vmax.f32 %v1992_v54, 0.0  ;;  %v882_v21 = vmul.f32 0.6931472, %v1594_v47  ;;  %v2239_v47 = vpop.permute.xlu0 %628 }
 0x14f   : > { %v954_v19 = vadd.f32 %v834_v0, %v2644_v18  ;;  %v816_v39 = vsel %vm2132_vm7, %v813_v28, %v810_v38  ;;  %v894_v23 = vmul.f32 %v1584_v44, %v893_v26  ;;  %v1596_v17 = vpop.eup %1595  ;;  %v2648_v31 = vmax.f32 %v1998_v60, 0.0  ;;  %vm2188_vm7 = vmand %vm1106_vm4, %vm1120_vm5 }
 0x150   : > { %v962_v52 = vadd.f32 %v906_v5, %v2647_v40  ;;  %vm2178_vm3 = vcmp.lt.f32.partialorder %v895_v45, 0.0004427343  ;;  %v868_v54 = vand.u32 2147483647, %v2137_v58  ;;  %v804_v12 = vmul.f32 1.442695, %v2111_v15 }
 0x151   : > { %v1002_v46 = vmul.f32 %v1919_v11, %v954_v19  ;;  %v952_v13 = vadd.f32 %v816_v39, %v2648_v31  ;;  %v888_v45 = vsel %vm2139_vm9, %v885_v36, %v882_v21  ;;  %v837_v60 = vmul.f32 0.6931472, %v1596_v17  ;;  %v1598_v29 = vpop.eup %1597  ;;  %vm1121_vm9 = vmand %vm1104_vm8, %vm1120_vm5  ;;  %v2664_v39 = vld [vmem:[#allocation15_spill] sm:$0xff] }
 0x152   : > { %v1010_v11 = vmul.f32 %v1977_v43, %v962_v52  ;;  %v866_v28 = vadd.f32 1.0, %v865_v16  ;;  %v2655_v43 = vmax.f32 %v2001_v61, 0.0  ;;  %vm1113_vm4 = vcmp.lt.s32.totalorder %v2040_v57, 200  ;;  %vm1129_vm8 = vmand %vm1112_vm10, %vm1120_vm5 }
 0x153   : > { %v1050_v44 = vsub.f32 %v1002_v46, %v2049_v14  ;;  %v1000_v15 = vmul.f32 %v1904_v6, %v952_v13  ;;  %1605 = vpow2.f32 %v804_v12  ;;  %v1600_v36 = vpop.eup %1599  ;;  %v843_v2 = vsel %vm2144_vm11, %v840_v7, %v837_v60  ;;  %vm2248_vm10 = vmand %vm1107_vm12, %vm1120_vm5 }
 0x154   : > { %v960_v55 = vadd.f32 %v888_v45, %v2655_v43  ;;  %v1058_v8 = vsub.f32 %v1010_v11, %v2072_v51  ;;  %v909_v14 = vmul.f32 0.6931472, %v1598_v29  ;;  %v2656_v6 = vand.u32 2147483647, %v2095_v33  ;;  %v1602_v3 = vpop.eup %1601  ;;  %vm2268_vm12 = vmand %vm1115_vm14, %vm1120_vm5  ;;  %v2673_v11 = vld [vmem:[#allocation6_spill] sm:$0xff]  ;;  %v2679_v29 = vld [vmem:[#allocation12_spill] sm:$0xff] }
 0x155   : > { %v2219_v61 = vsel %vm2188_vm7, %v1050_v44, 0.0  ;;  %v1048_v37 = vsub.f32 %v1000_v15, %v2077_v62  ;;  %v2657_v26 = vmax.f32 %v2025_v30, 0.0  ;;  %vm1110_vm6 = vcmp.lt.s32.totalorder %v2044_v1, 200  ;;  %v2674_v45 = vld [vmem:[#allocation18_spill] sm:$0xff]  ;;  %v2680_v43 = vld [vmem:[#allocation27_spill] sm:$0xff]  ;;  %v2691_v1 = vld [vmem:[#allocation20_spill] sm:$0xff] }
 0x156   : > { %v764_v22 = vsub.f32 0.0, %v2656_v6  ;;  %v1008_v51 = vmul.f32 %v1967_v35, %v960_v55  ;;  %v2228_v7 = vsel %vm2200_vm2, %v1058_v8, 0.0  ;;  %v915_v62 = vsel %vm2150_vm13, %v912_v63, %v909_v14  ;;  %v1604_v40 = vpop.eup %1603  ;;  %vm2282_vm13 = vmor %vm650_vm0, %vm671_vm1  ;;  %v2682_v14 = vld [vmem:[#allocation14_spill] sm:$0xff]  ;;  %1159 = vst [vmem:[#allocation2 + $0x10] sm:$0xff] (!%p1422_p9), %v2219_v61 }
 0x157   : > { %v955_v0 = vadd.f32 %v843_v2, %v2657_v26  ;;  %v819_v25 = vmul.f32 0.6931472, %v1600_v36  ;;  %v2236_v16 = vsel %vm1121_vm9, %v1048_v37, 0.0  ;;  %v2658_v19 = vmax.f32 %v2031_v41, 0.0  ;;  %v2663_v41 = vld [vmem:[#allocation23_spill] sm:$0xff]  ;;  %vm1130_vm0 = vmand %vm1113_vm4, %vm1120_vm5  ;;  %1167 = vst [vmem:[#allocation2 + $0x50] sm:$0xff] (!%p1422_p9), %v2228_v7 }
 0x158   : > { %v784_v35 = vmul.f32 1.442695, %v764_v22  ;;  %v1056_v30 = vsub.f32 %v1008_v51, %v2083_v27  ;;  %v891_v27 = vmul.f32 0.6931472, %v1602_v3  ;;  %vm2254_vm11 = vcmp.lt.f32.partialorder %v868_v54, 0.0004427343  ;;  %v635_v22 = vpop.permute.xlu0 %634 }
 0x159   : > { %v1003_v18 = vmul.f32 %v1942_v20, %v955_v0  ;;  %v963_v5 = vadd.f32 %v915_v62, %v2658_v19  ;;  %v825_v42 = vsel %vm2162_vm15, %v822_v32, %v819_v25  ;;  %v2666_v17 = vmax.f32 %v2665_v24, 0.0  ;;  %v2669_v54 = vld [vmem:[#allocation26_spill] sm:$0xff]  ;;  %v2683_v37 = vld [vmem:[#allocation19_spill] sm:$0xff]  ;;  %1157 = vst [vmem:[#allocation2] sm:$0xff] (!%p1422_p9), %v2236_v16 }
 0x15a   : > { %1607 = vpow2.f32 %v784_v35  ;;  %v2258_v20 = vsel %vm1129_vm8, %v1056_v30, 0.0  ;;  %v897_v9 = vsel %vm2178_vm3, %v894_v23, %v891_v27  ;;  %v864_v31 = vmul.f32 0.6931472, %v1604_v40  ;;  %v2672_v23 = vld [vmem:[#allocation24_spill] sm:$0xff]  ;;  %v2686_v62 = vld [vmem:[#allocation11_spill] sm:$0xff]  ;;  %v632_v27 = vpop.permute.xlu1 %631  ;;  %vm1127_vm3 = vmand %vm1110_vm6, %vm1120_vm5 }
 0x15b   : > { %v1051_v52 = vsub.f32 %v1003_v18, %v2663_v41  ;;  %v1011_v21 = vmul.f32 %v2664_v39, %v963_v5  ;;  %v953_v46 = vadd.f32 %v825_v42, %v2666_v17  ;;  %v867_v13 = vmul.f32 %v2137_v58, %v866_v28  ;;  %v2687_v5 = vld [vmem:[#allocation10_spill] sm:$0xff]  ;;  %v2688_v39 = vld [vmem:[#allocation9_spill] sm:$0xff]  ;;  %v2689_v17 = vld [vmem:[#allocation4_spill] sm:$0xff]  ;;  %1165 = vst [vmem:[#allocation2 + $0x40] sm:$0xff] (!%p1422_p9), %v2258_v20 }
 0x15c   : > { %v756_v12 = vand.u32 2147483647, %v2669_v54  ;;  %v2675_v60 = vmax.f32 %v2674_v45, 0.0  ;;  %vm2676_vm14 = vcmp.lt.s32.totalorder %v2037_v56, 200  ;;  %v1041_v44 = vmul.f32 %v2679_v29, %v2674_v45  ;;  %v2681_v56 = vld [vmem:[#allocation25_spill] sm:$0xff] }
 0x15d   : > { %v2288_v38 = vsel %vm2248_vm10, %v1051_v52, 0.0  ;;  %v1059_v10 = vsub.f32 %v1011_v21, %v2672_v23  ;;  %v1001_v58 = vmul.f32 %v2673_v11, %v953_v46  ;;  %vm2298_vm15 = vmand %vm2676_vm14, %vm1120_vm5  ;;  %v870_v53 = vsel %vm2254_vm11, %v867_v13, %v864_v31  ;;  %v2307_v36 = vpop.eup %1605  ;;  %v2690_v46 = vld [vmem:[#allocation17_spill] sm:$0xff] }
 0x15e   : > { %v961_v28 = vadd.f32 %v897_v9, %v2675_v60  ;;  %v772_v15 = vsub.f32 0.0, %v756_v12  ;;  %v751_v55 = vand.u32 2147483647, %v2680_v43  ;;  %v2684_v51 = vmax.f32 %v2683_v37, 0.0  ;;  %v638_v48 = vpop.permute.xlu1 %637  ;;  %v2694_v29 = vld [vmem:[#allocation5_spill] sm:$0xff]  ;;  %1160 = vst [vmem:[#allocation2 + $0x18] sm:$0xff] (!%p1422_p9), %v2288_v38 }
 0x15f   : > { %v2311_v8 = vsel %vm2268_vm12, %v1059_v10, 0.0  ;;  %v1049_v2 = vsub.f32 %v1001_v58, %v2681_v56  ;;  %v2685_v0 = vmov 0.0   ;;  %v1038_v25 = vmul.f32 %v2686_v62, %v2683_v37  ;;  %v2693_v10 = vld [vmem:[#allocation7_spill] sm:$0xff]  ;;  %v2695_v62 = vld [vmem:[#allocation13_spill] sm:$0xff] }
 0x160   : > { %v1009_v6 = vmul.f32 %v2682_v14, %v961_v28  ;;  %v958_v26 = vadd.f32 %v870_v53, %v2684_v51  ;;  %v1411_v3 = vsel %vm2282_vm13, 1.0, %v2685_v0  ;;  %v934_v35 = vadd.f32 1.0, %v2307_v36  ;;  %1168 = vst [vmem:[#allocation2 + $0x58] sm:$0xff] (!%p1422_p9), %v2311_v8 }
 0x161   : > { %v800_v30 = vmul.f32 1.442695, %v772_v15  ;;  %v2329_v18 = vsel %vm2298_vm15, %v1049_v2, 0.0  ;;  %v767_v4 = vsub.f32 0.0, %v751_v55  ;;  %v975_v42 = vmul.f32 19.0, %v1411_v3 }
 0x162   : > { %v1057_v19 = vsub.f32 %v1009_v6, %v1041_v44  ;;  %v1006_v40 = vmul.f32 %v2687_v5, %v958_v26  ;;  %vm657_vm1 = vcmp.eq.s32.totalorder %v635_v22, %v1840_v49  ;;  %vm678_vm2 = vcmp.eq.s32.totalorder %v635_v22, %v1842_v50  ;;  %1158 = vst [vmem:[#allocation2 + $0x8] sm:$0xff] (!%p1422_p9), %v2329_v18 }
 0x163   : > { %1609 = vlog2.f32 %v934_v35  ;;  %v790_v41 = vmul.f32 1.442695, %v767_v4  ;;  %v2343_v21 = vmul.f32 19.0, %v2688_v39  ;;  %v2346_v24 = vmul.f32 20.0, %v2688_v39  ;;  %vm694_vm7 = vmor %vm657_vm1, %vm678_vm2 }
 0x164   : > { %v2338_v57 = vsel %vm1130_vm0, %v1057_v19, 0.0  ;;  %v1054_v63 = vsub.f32 %v1006_v40, %v1038_v25  ;;  %1611 = vpow2.f32 %v800_v30  ;;  %v2340_v52 = vpop.eup %1607  ;;  %v2350_v32 = vmul.f32 %v2690_v46, %v2689_v17  ;;  %v2698_v40 = vld [vmem:[#allocation22_spill] sm:$0xff] }
 0x165   : > { %v2354_v9 = vmul.f32 %v2689_v17, %v2691_v1  ;;  %v937_v13 = vmul.f32 -0.5, %v2307_v36  ;;  %v844_v12 = vadd.f32 1.0, %v2340_v52  ;;  %v2362_v23 = vmul.f32 %v2689_v17, %v2692_v34  ;;  %1166 = vst [vmem:[#allocation2 + $0x48] sm:$0xff] (!%p1422_p9), %v2338_v57 }
 0x166   : > { %v2356_v31 = vsel %vm1127_vm3, %v1054_v63, 0.0  ;;  %v2365_v11 = vadd.f32 1.0, %v2693_v10  ;;  %v2367_v58 = vmul.f32 20.0, %v1411_v3  ;;  %1613 = vpow2.f32 %v790_v41 }
 0x167   : > { %v759_v45 = vand.u32 2147483647, %v2350_v32  ;;  %v2370_v60 = vadd.f32 1.0, %v975_v42  ;;  %vm655_vm4 = vcmp.eq.s32.totalorder %v2239_v47, %v1840_v49  ;;  %vm676_vm9 = vcmp.eq.s32.totalorder %v2239_v47, %v1842_v50  ;;  %1163 = vst [vmem:[#allocation2 + $0x30] sm:$0xff] (!%p1422_p9), %v2356_v31 }
 0x168   : > { %1615 = vlog2.f32 %v844_v12  ;;  %v1418_v28 = vsel %vm694_vm7, 1.0, %v2685_v0  ;;  %v1079_v44 = vadd.s32 112, %v2694_v29  ;;  %v749_v15 = vand.u32 2147483647, %v2354_v9  ;;  %vm2395_vm11 = vmor %vm655_vm4, %vm676_vm9 }
 0x169   : > { %v775_v53 = vsub.f32 0.0, %v759_v45  ;;  %vm656_vm6 = vcmp.eq.s32.totalorder %v632_v27, %v1840_v49  ;;  %vm677_vm8 = vcmp.eq.s32.totalorder %v632_v27, %v1842_v50  ;;  %v938_v55 = vadd.f32 1.0, %v937_v13 }
 0x16a   : > { %v757_v56 = vand.u32 2147483647, %v2362_v23  ;;  %v940_v2 = vand.u32 2147483647, %v2307_v36  ;;  %v847_v14 = vmul.f32 -0.5, %v2340_v52  ;;  %v765_v22 = vsub.f32 0.0, %v749_v15  ;;  %vm2405_vm12 = vmor %vm656_vm6, %vm677_vm8 }
 0x16b   : > { %v806_v6 = vmul.f32 1.442695, %v775_v53  ;;  %v982_v37 = vmul.f32 19.0, %v1418_v28  ;;  %v1030_v51 = vmul.f32 20.0, %v1418_v28  ;;  %vm658_vm10 = vcmp.eq.s32.totalorder %v638_v48, %v1840_v49 }
 0x16c   : > { %v773_v26 = vsub.f32 0.0, %v757_v56  ;;  %v1097_v25 = vadd.s32 %v2695_v62, %v1079_v44  ;;  %v1069_v35 = vadd.s32 32, %v2694_v29  ;;  %v786_v30 = vmul.f32 1.442695, %v765_v22 }
 0x16d   : > { %v1610_v3 = vpop.eup %1609  ;;  %1617 = vpow2.f32 %v806_v6  ;;  %v742_v4 = vmax.f32 %v2698_v40, 0.0  ;;  %v939_v63 = vmul.f32 %v2307_v36, %v938_v55  ;;  %vm941_vm13 = vcmp.lt.f32.partialorder %v940_v2, 0.0004427343 }
 0x16e   : > { %v2387_v19 = vpop.eup %1611  ;;  %v936_v42 = vmul.f32 0.6931472, %v1610_v3  ;;  %v802_v41 = vmul.f32 1.442695, %v773_v26  ;;  %v848_v47 = vadd.f32 1.0, %v847_v14  ;;  %1619 = vpow2.f32 %v786_v30 }
 0x16f   : > { %v916_v17 = vadd.f32 1.0, %v2387_v19  ;;  %vm679_vm14 = vcmp.eq.s32.totalorder %v638_v48, %v1842_v50  ;;  %v850_v1 = vand.u32 2147483647, %v2340_v52  ;;  %v998_v13 = vadd.f32 1.0, %v982_v37 }
 0x170   : > { %v942_v46 = vsel %vm941_vm13, %v939_v63, %v936_v42  ;;  %1621 = vpow2.f32 %v802_v41  ;;  %v2412_v36 = vpop.eup %1613  ;;  %vm1118_vm15 = vcmp.lt.s32.totalorder %v1097_v25, 200  ;;  %v1416_v34 = vsel %vm2395_vm11, 1.0, %v2685_v0  ;;  %vm695_vm0 = vmor %vm658_vm10, %vm679_vm14 }
 0x171   : > { %v966_v12 = vadd.f32 %v942_v46, %v742_v4  ;;  %1623 = vlog2.f32 %v916_v17  ;;  %v1417_v10 = vsel %vm2405_vm12, 1.0, %v2685_v0  ;;  %v1087_v50 = vadd.s32 %v2695_v62, %v1069_v35  ;;  %vm2428_vm1 = vmand %vm1118_vm15, %vm1120_vm5 }
 0x172   : > { %v1616_v27 = vpop.eup %1615  ;;  %v871_v45 = vadd.f32 1.0, %v2412_v36  ;;  %v1046_v44 = vmul.f32 %v1030_v51, %v2698_v40  ;;  %v849_v15 = vmul.f32 %v2340_v52, %v848_v47  ;;  %v732_v56 = vmax.f32 %v2095_v33, 0.0 }
 0x173   : > { %v1014_v28 = vmul.f32 %v998_v13, %v966_v12  ;;  %v846_v53 = vmul.f32 0.6931472, %v1616_v27  ;;  %vm851_vm2 = vcmp.lt.f32.partialorder %v850_v1, 0.0004427343  ;;  %v919_v2 = vmul.f32 -0.5, %v2387_v19 }
 0x174   : > { %1625 = vlog2.f32 %v871_v45  ;;  %v980_v49 = vmul.f32 19.0, %v1416_v34  ;;  %v1028_v48 = vmul.f32 20.0, %v1416_v34  ;;  %v1419_v22 = vsel %vm695_vm0, 1.0, %v2685_v0  ;;  %v2703_v0 = vld [vmem:[#allocation8_spill] sm:$0xff] }
 0x175   : > { %v1062_v14 = vsub.f32 %v1014_v28, %v1046_v44  ;;  %v852_v6 = vsel %vm851_vm2, %v849_v15, %v846_v53  ;;  %vm1108_vm3 = vcmp.lt.s32.totalorder %v1087_v50, 200  ;;  %v1077_v52 = vadd.s32 96, %v2694_v29 }
 0x176   : > { %v956_v37 = vadd.f32 %v852_v6, %v732_v56  ;;  %v2438_v26 = vmul.f32 19.0, %v1417_v10  ;;  %v2440_v3 = vmul.f32 20.0, %v1417_v10  ;;  %v874_v35 = vmul.f32 -0.5, %v2412_v36  ;;  %vm1125_vm7 = vmand %vm1108_vm3, %vm1120_vm5 }
 0x177   : > { %v2436_v51 = vpop.eup %1617  ;;  %v2444_v25 = vsel %vm2428_vm1, %v1062_v14, 0.0  ;;  %v1036_v5 = vmul.f32 %v2703_v0, %v2095_v33  ;;  %v920_v40 = vadd.f32 1.0, %v919_v2  ;;  %v996_v63 = vadd.f32 1.0, %v980_v49 }
 0x178   : > { %v1004_v30 = vmul.f32 %v2365_v11, %v956_v37  ;;  %v943_v4 = vadd.f32 1.0, %v2436_v51  ;;  %v2451_v42 = vpop.eup %1619  ;;  %v983_v41 = vmul.f32 19.0, %v1419_v22  ;;  %v2453_v39 = vmul.f32 20.0, %v1419_v22  ;;  %1171 = vst [vmem:[#allocation2 + $0x70] sm:$0xff] (!%p1422_p9), %v2444_v25 }
 0x179   : > { %v922_v47 = vand.u32 2147483647, %v2387_v19  ;;  %v1095_v33 = vadd.s32 %v2695_v62, %v1077_v52  ;;  %v1072_v46 = vadd.s32 56, %v2694_v29  ;;  %v875_v13 = vadd.f32 1.0, %v874_v35 }
 0x17a   : > { %v2459_v17 = vpop.eup %1621  ;;  %v1052_v11 = vsub.f32 %v1004_v30, %v1036_v5  ;;  %1627 = vlog2.f32 %v943_v4  ;;  %v1080_v12 = vadd.s32 120, %v2694_v29  ;;  %v853_v27 = vadd.f32 1.0, %v2451_v42 }
 0x17b   : > { %v1624_v1 = vpop.eup %1623  ;;  %v925_v34 = vadd.f32 1.0, %v2459_v17  ;;  %v921_v45 = vmul.f32 %v2387_v19, %v920_v40  ;;  %v877_v28 = vand.u32 2147483647, %v2412_v36  ;;  %v740_v44 = vmax.f32 %v2669_v54, 0.0 }
 0x17c   : > { %v2466_v10 = vsel %vm1125_vm7, %v1052_v11, 0.0  ;;  %v918_v50 = vmul.f32 0.6931472, %v1624_v1  ;;  %vm923_vm4 = vcmp.lt.f32.partialorder %v922_v47, 0.0004427343  ;;  %v946_v53 = vmul.f32 -0.5, %v2436_v51 }
 0x17d   : > { %1629 = vlog2.f32 %v853_v27  ;;  %vm1116_vm9 = vcmp.lt.s32.totalorder %v1095_v33, 200  ;;  %v1090_v56 = vadd.s32 %v2695_v62, %v1072_v46  ;;  %v876_v14 = vmul.f32 %v2412_v36, %v875_v13  ;;  %1161 = vst [vmem:[#allocation2 + $0x20] sm:$0xff] (!%p1422_p9), %v2466_v10 }
 0x17e   : > { %v1626_v15 = vpop.eup %1625  ;;  %v924_v55 = vsel %vm923_vm4, %v921_v45, %v918_v50  ;;  %1631 = vlog2.f32 %v925_v34  ;;  %v1098_v19 = vadd.s32 %v2695_v62, %v1080_v12  ;;  %v1044_v6 = vmul.f32 %v1028_v48, %v2669_v54  ;;  %vm1133_vm8 = vmand %vm1116_vm9, %vm1120_vm5 }
 0x17f   : > { %v964_v2 = vadd.f32 %v924_v55, %v740_v44  ;;  %v873_v49 = vmul.f32 0.6931472, %v1626_v15  ;;  %v735_v22 = vmax.f32 %v2680_v43, 0.0  ;;  %vm878_vm6 = vcmp.lt.f32.partialorder %v877_v28, 0.0004427343 }
 0x180   : > { %v856_v37 = vmul.f32 -0.5, %v2451_v42  ;;  %v947_v30 = vadd.f32 1.0, %v946_v53  ;;  %v928_v0 = vmul.f32 -0.5, %v2459_v17  ;;  %v999_v5 = vadd.f32 1.0, %v983_v41 }
 0x181   : > { %v1012_v52 = vmul.f32 %v996_v63, %v964_v2  ;;  %v879_v35 = vsel %vm878_vm6, %v876_v14, %v873_v49  ;;  %vm1111_vm10 = vcmp.lt.s32.totalorder %v1090_v56, 200  ;;  %v949_v40 = vand.u32 2147483647, %v2436_v51 }
 0x182   : > { %v959_v36 = vadd.f32 %v879_v35, %v735_v22  ;;  %vm1119_vm11 = vcmp.lt.s32.totalorder %v1098_v19, 200  ;;  %v1070_v48 = vadd.s32 40, %v2694_v29  ;;  %v1078_v4 = vadd.s32 104, %v2694_v29  ;;  %vm1128_vm12 = vmand %vm1111_vm10, %vm1120_vm5 }
 0x183   : > { %v1060_v54 = vsub.f32 %v1012_v52, %v1044_v6  ;;  %v1039_v41 = vmul.f32 %v2367_v58, %v2680_v43  ;;  %v857_v11 = vadd.f32 1.0, %v856_v37  ;;  %v859_v33 = vand.u32 2147483647, %v2451_v42  ;;  %vm1136_vm0 = vmand %vm1119_vm11, %vm1120_vm5 }
 0x184   : > { %v1628_v63 = vpop.eup %1627  ;;  %v1007_v47 = vmul.f32 %v2370_v60, %v959_v36  ;;  %v948_v13 = vmul.f32 %v2436_v51, %v947_v30  ;;  %v929_v12 = vadd.f32 1.0, %v928_v0  ;;  %v743_v29 = vmax.f32 %v2350_v32, 0.0 }
 0x185   : > { %v2489_v46 = vsel %vm1133_vm8, %v1060_v54, 0.0  ;;  %v945_v1 = vmul.f32 0.6931472, %v1628_v63  ;;  %vm950_vm13 = vcmp.lt.f32.partialorder %v949_v40, 0.0004427343  ;;  %v1047_v58 = vmul.f32 %v2453_v39, %v2350_v32 }
 0x186   : > { %v1055_v27 = vsub.f32 %v1007_v47, %v1039_v41  ;;  %v931_v60 = vand.u32 2147483647, %v2459_v17  ;;  %v1088_v50 = vadd.s32 %v2695_v62, %v1070_v48  ;;  %v1096_v45 = vadd.s32 %v2695_v62, %v1078_v4  ;;  %1169 = vst [vmem:[#allocation2 + $0x60] sm:$0xff] (!%p1422_p9), %v2489_v46 }
 0x187   : > { %v1630_v34 = vpop.eup %1629  ;;  %v951_v43 = vsel %vm950_vm13, %v948_v13, %v945_v1  ;;  %v858_v15 = vmul.f32 %v2451_v42, %v857_v11  ;;  %v733_v55 = vmax.f32 %v2354_v9, 0.0  ;;  %vm860_vm14 = vcmp.lt.f32.partialorder %v859_v33, 0.0004427343 }
 0x188   : > { %v1632_v28 = vpop.eup %1631  ;;  %v2500_v44 = vsel %vm1128_vm12, %v1055_v27, 0.0  ;;  %v967_v51 = vadd.f32 %v951_v43, %v743_v29  ;;  %v855_v53 = vmul.f32 0.6931472, %v1630_v34  ;;  %v930_v2 = vmul.f32 %v2459_v17, %v929_v12 }
 0x189   : > { %v927_v56 = vmul.f32 0.6931472, %v1632_v28  ;;  %v741_v32 = vmax.f32 %v2362_v23, 0.0  ;;  %vm932_vm15 = vcmp.lt.f32.partialorder %v931_v60, 0.0004427343  ;;  %v989_v62 = vadd.f32 1.0, %v2343_v21 }
 0x18a   : > { %v1015_v49 = vmul.f32 %v999_v5, %v967_v51  ;;  %v861_v14 = vsel %vm860_vm14, %v858_v15, %v855_v53  ;;  %vm1109_vm1 = vcmp.lt.s32.totalorder %v1088_v50, 200  ;;  %v997_v6 = vadd.f32 1.0, %v2438_v26  ;;  %1164 = vst [vmem:[#allocation2 + $0x38] sm:$0xff] (!%p1422_p9), %v2500_v44 }
 0x18b   : > { %v957_v39 = vadd.f32 %v861_v14, %v733_v55  ;;  %v933_v42 = vsel %vm932_vm15, %v930_v2, %v927_v56  ;;  %vm1117_vm2 = vcmp.lt.s32.totalorder %v1096_v45, 200  ;;  %v1037_v52 = vmul.f32 %v2346_v24, %v2354_v9  ;;  %vm1126_vm3 = vmand %vm1109_vm1, %vm1120_vm5 }
 0x18c   : > { %v1063_v22 = vsub.f32 %v1015_v49, %v1047_v58  ;;  %v965_v37 = vadd.f32 %v933_v42, %v741_v32  ;;  %v1045_v19 = vmul.f32 %v2440_v3, %v2362_v23  ;;  %vm1134_vm7 = vmand %vm1117_vm2, %vm1120_vm5  ;;  %1156 = sbr.rel (%p1422_p9) target bundleno = 404 (0x194), region = 44 }
 0x18d   : > { %v1005_v17 = vmul.f32 %v989_v62, %v957_v39 }
 0x18e   : > { %v2513_v35 = vsel %vm1136_vm0, %v1063_v22, 0.0  ;;  %v1013_v21 = vmul.f32 %v997_v6, %v965_v37 }
 0x18f   : > { %v1053_v30 = vsub.f32 %v1005_v17, %v1037_v52  ;;  %1172 = vst [vmem:[#allocation2 + $0x78] sm:$0xff] (!%p1422_p9), %v2513_v35 }
 0x190   : > { %v1061_v26 = vsub.f32 %v1013_v21, %v1045_v19 }
 0x191   : > { %v1142_v0 = vsel %vm1126_vm3, %v1053_v30, 0.0 }
 0x192   : > { %v1150_v5 = vsel %vm1134_vm7, %v1061_v26, 0.0  ;;  %1162 = vst [vmem:[#allocation2 + $0x28] sm:$0xff] (!%p1422_p9), %v1142_v0 }
 0x193   : > { %1170 = vst [vmem:[#allocation2 + $0x68] sm:$0xff] %v1150_v5 }
 0x194 PF: > { %p1423_p10 = scmp.le.s32.totalorder %s1655_s20, 0 }
 0x195   : > { %v1177_v59 = vld [vmem:[#allocation2] sm:$0xff] (!%p1423_p10)  ;;  %v1178_v24 = vld [vmem:[#allocation2 + $0x8] sm:$0xff] (!%p1423_p10)  ;;  %v1179_v9 = vld [vmem:[#allocation2 + $0x10] sm:$0xff] (!%p1423_p10) }
 0x196   : > { %1176 = sbr.rel (%p1423_p10) target bundleno = 416 (0x1a0), region = 48  ;;  %v1193_v23 = vadd.f32 (!%p1423_p10), %v1177_v59, %v2236_v16  ;;  %v1194_v3 = vadd.f32 (!%p1423_p10), %v1178_v24, %v2329_v18  ;;  %v1195_v36 = vadd.f32 (!%p1423_p10), %v1179_v9, %v2219_v61  ;;  %v1180_v40 = vld [vmem:[#allocation2 + $0x18] sm:$0xff] (!%p1423_p10)  ;;  %v1181_v54 = vld [vmem:[#allocation2 + $0x20] sm:$0xff] (!%p1423_p10)  ;;  %v1183_v41 = vld [vmem:[#allocation2 + $0x30] sm:$0xff] (!%p1423_p10) }
 0x197   : > { %v1196_v4 = vadd.f32 (!%p1423_p10), %v1180_v40, %v2288_v38  ;;  %v1197_v63 = vadd.f32 (!%p1423_p10), %v1181_v54, %v2466_v10  ;;  %v1184_v11 = vld [vmem:[#allocation2 + $0x38] sm:$0xff] (!%p1423_p10)  ;;  %v1185_v33 = vld [vmem:[#allocation2 + $0x40] sm:$0xff] (!%p1423_p10)  ;;  %v1199_v16 = vadd.f32 (!%p1423_p10), %v1183_v41, %v2356_v31  ;;  %v1186_v1 = vld [vmem:[#allocation2 + $0x48] sm:$0xff] (!%p1423_p10) }
 0x198   : > { %1209 = vst [vmem:[#allocation2] sm:$0xff] (!%p1423_p10), %v1193_v23  ;;  %1210 = vst [vmem:[#allocation2 + $0x8] sm:$0xff] (!%p1423_p10), %v1194_v3  ;;  %v1200_v18 = vadd.f32 (!%p1423_p10), %v1184_v11, %v2500_v44  ;;  %v1201_v61 = vadd.f32 (!%p1423_p10), %v1185_v33, %v2258_v20  ;;  %v1187_v13 = vld [vmem:[#allocation2 + $0x50] sm:$0xff] (!%p1423_p10)  ;;  %v1188_v12 = vld [vmem:[#allocation2 + $0x58] sm:$0xff] (!%p1423_p10)  ;;  %v1202_v38 = vadd.f32 (!%p1423_p10), %v1186_v1, %v2338_v57 }
 0x199   : > { %1211 = vst [vmem:[#allocation2 + $0x10] sm:$0xff] (!%p1423_p10), %v1195_v36  ;;  %1212 = vst [vmem:[#allocation2 + $0x18] sm:$0xff] (!%p1423_p10), %v1196_v4  ;;  %v1203_v10 = vadd.f32 (!%p1423_p10), %v1187_v13, %v2228_v7  ;;  %v1204_v27 = vadd.f32 (!%p1423_p10), %v1188_v12, %v2311_v8  ;;  %v1189_v29 = vld [vmem:[#allocation2 + $0x60] sm:$0xff] (!%p1423_p10)  ;;  %v1191_v34 = vld [vmem:[#allocation2 + $0x70] sm:$0xff] (!%p1423_p10) }
 0x19a   : > { %v1182_v48 = vld [vmem:[#allocation2 + $0x28] sm:$0xff] (!%p1423_p10)  ;;  %1213 = vst [vmem:[#allocation2 + $0x20] sm:$0xff] (!%p1423_p10), %v1197_v63  ;;  %1215 = vst [vmem:[#allocation2 + $0x30] sm:$0xff] (!%p1423_p10), %v1199_v16  ;;  %v1205_v20 = vadd.f32 (!%p1423_p10), %v1189_v29, %v2489_v46  ;;  %v1207_v43 = vadd.f32 (!%p1423_p10), %v1191_v34, %v2444_v25  ;;  %v1192_v58 = vld [vmem:[#allocation2 + $0x78] sm:$0xff] (!%p1423_p10) }
 0x19b   : > { %v1198_v47 = vadd.f32 (!%p1423_p10), %v1182_v48, %v1142_v0  ;;  %v1190_v60 = vld [vmem:[#allocation2 + $0x68] sm:$0xff] (!%p1423_p10)  ;;  %1216 = vst [vmem:[#allocation2 + $0x38] sm:$0xff] (!%p1423_p10), %v1200_v18  ;;  %1217 = vst [vmem:[#allocation2 + $0x40] sm:$0xff] (!%p1423_p10), %v1201_v61  ;;  %v1208_v57 = vadd.f32 (!%p1423_p10), %v1192_v58, %v2513_v35 }
 0x19c   : > { %v1206_v31 = vadd.f32 (!%p1423_p10), %v1190_v60, %v1150_v5  ;;  %1218 = vst [vmem:[#allocation2 + $0x48] sm:$0xff] (!%p1423_p10), %v1202_v38  ;;  %1219 = vst [vmem:[#allocation2 + $0x50] sm:$0xff] (!%p1423_p10), %v1203_v10 }
 0x19d   : > { %1214 = vst [vmem:[#allocation2 + $0x28] sm:$0xff] %v1198_v47  ;;  %1220 = vst [vmem:[#allocation2 + $0x58] sm:$0xff] %v1204_v27 }
 0x19e   : > { %1221 = vst [vmem:[#allocation2 + $0x60] sm:$0xff] %v1205_v20  ;;  %1222 = vst [vmem:[#allocation2 + $0x68] sm:$0xff] %v1206_v31 }
 0x19f   : > { %1223 = vst [vmem:[#allocation2 + $0x70] sm:$0xff] %v1207_v43  ;;  %1224 = vst [vmem:[#allocation2 + $0x78] sm:$0xff] %v1208_v57 }
 0x1a0 PF: > { %p1424_p11 = scmp.ne.s32.totalorder %s1655_s20, 1 }
 0x1a1   : > { %vm1270_vm5 = vcmask (!%p1424_p11), 0  }
 0x1a2   : > { %1228 = sbr.rel (%p1424_p11) target bundleno = 655 (0x28f), region = 52  ;;  %v1229_v7 = vld [vmem:[#allocation2] sm:$0xff] (!%p1424_p11)  ;;  %v1230_v8 = vld [vmem:[#allocation2 + $0x8] sm:$0xff] (!%p1424_p11) }
 0x1a3   : > { %v1231_v46 = vld [vmem:[#allocation2 + $0x10] sm:$0xff] (!%p1424_p11)  ;;  %v1245_v50 = vadd.f32 (!%p1424_p11), %v1230_v8, %v1229_v7  ;;  %v1232_v45 = vld [vmem:[#allocation2 + $0x18] sm:$0xff] (!%p1424_p11) }
 0x1a4   : > { %v1233_v28 = vld [vmem:[#allocation2 + $0x20] sm:$0xff] (!%p1424_p11)  ;;  %v1235_v15 = vld [vmem:[#allocation2 + $0x30] sm:$0xff] (!%p1424_p11) }
 0x1a5   : > { %v1246_v25 = vadd.f32 (!%p1424_p11), %v1245_v50, %v1231_v46  ;;  %v1236_v56 = vld [vmem:[#allocation2 + $0x38] sm:$0xff] (!%p1424_p11)  ;;  %v1237_v49 = vld [vmem:[#allocation2 + $0x40] sm:$0xff] (!%p1424_p11)  ;;  %v1242_v52 = vld [vmem:[#allocation2 + $0x68] sm:$0xff] (!%p1424_p11) }
 0x1a6   : > { %v1238_v32 = vld [vmem:[#allocation2 + $0x48] sm:$0xff] (!%p1424_p11)  ;;  %v1239_v39 = vld [vmem:[#allocation2 + $0x50] sm:$0xff] (!%p1424_p11)  ;;  %v1241_v37 = vld [vmem:[#allocation2 + $0x60] sm:$0xff] (!%p1424_p11) }
 0x1a7   : > { %v1247_v44 = vadd.f32 (!%p1424_p11), %v1246_v25, %v1232_v45  ;;  %v1234_v51 = vld [vmem:[#allocation2 + $0x28] sm:$0xff] (!%p1424_p11)  ;;  %v1240_v6 = vld [vmem:[#allocation2 + $0x58] sm:$0xff] (!%p1424_p11)  ;;  %v1243_v21 = vld [vmem:[#allocation2 + $0x70] sm:$0xff] (!%p1424_p11) }
 0x1a8   : > { %v1244_v30 = vld [vmem:[#allocation2 + $0x78] sm:$0xff] (!%p1424_p11) }
 0x1a9   : > { %v1248_v53 = vadd.f32 %v1247_v44, %v1233_v28 }
 0x1ab   : > { %v1249_v55 = vadd.f32 %v1248_v53, %v1234_v51 }
 0x1ad   : > { %v1250_v2 = vadd.f32 %v1249_v55, %v1235_v15 }
 0x1af   : > { %v1251_v14 = vadd.f32 %v1250_v2, %v1236_v56 }
 0x1b1   : > { %v1252_v62 = vadd.f32 %v1251_v14, %v1237_v49 }
 0x1b3   : > { %v1253_v42 = vadd.f32 %v1252_v62, %v1238_v32 }
 0x1b5   : > { %v1254_v22 = vadd.f32 %v1253_v42, %v1239_v39 }
 0x1b7   : > { %v1255_v17 = vadd.f32 %v1254_v22, %v1240_v6 }
 0x1b9   : > { %v1256_v35 = vadd.f32 %v1255_v17, %v1241_v37 }
 0x1bb   : > { %v1257_v19 = vadd.f32 %v1256_v35, %v1242_v52 }
 0x1bd   : > { %v1258_v26 = vadd.f32 %v1257_v19, %v1243_v21 }
 0x1bf   : > { %v1259_v0 = vadd.f32 %v1258_v26, %v1244_v30 }
 0x1c1   : > { %1260 = vadd.xlane.f32.xlu0 %v1259_v0 }
 0x24e   : > { %v1261_v5 = vpop.xlane.xlu0 %1260 }
 0x24f   : > { %v1262_v59 = vrot.slane %v1261_v5, 4 }
 0x251   : > { %v1263_v24 = vadd.f32 %v1262_v59, %v1261_v5 }
 0x253   : > { %v1264_v9 = vrot.slane %v1263_v24, 2 }
 0x255   : > { %v1265_v23 = vadd.f32 %v1264_v9, %v1263_v24 }
 0x257   : > { %v1266_v3 = vrot.slane %v1265_v23, 1 }
 0x259   : > { %v1267_v36 = vadd.f32 %v1266_v3, %v1265_v23 }
 0x25b   : > { %1507 = vpush %v1267_v36 }
 0x28c   : > { %s1508_s20 = spop %1507 }
 0x28d   : > { %v1269_v40 = vstv %s1508_s20 }
 0x28e   : > { %1271 = vst.msk [vmem:[%s296_s30] sm:$0x1] %vm1270_vm5, %v1269_v40 }
 0x28f PF: > { %s16_s24 = sadd.s32 1, %s1671_s24   ;;  %s2704_s20 = smov %s1663_s22 }
 0x290   : > { %p13_p12 = scmp.ge.s32.totalorder %s16_s24, 6   ;;  %s2705_s21 = smov %s1667_s23 }
 0x291   : > { %s2706_s22 = smov %s2709_s0  ;;  %s2707_s23 = smov %s2713_s25 }
 0x292   :  { %15 = sbr.rel (!%p13_p12) target bundleno = 3 (0x3), region = 91 }

</bundles_post_ra>
